<compile_context>
chip_gen: v7x
topology: tpu7x:2x2x1
jax: 0.10.0
libtpu: 0.0.40
codegen_flags: <defaults>
</compile_context>

<pallas_src>
import math
from functools import partial

import jax
import jax.numpy as jnp
from jax.experimental import pallas as pl
from jax.experimental.pallas import tpu as pltpu

# ---------------- small model config (consistent with BATModelArgs) ----------
DIM = 32          # args.dim
N_LAYERS = 2      # args.n_layers
N_HEADS = 4       # args.n_heads
HEAD_DIM = DIM // N_HEADS
VOCAB = 64        # args.vocab_size
NORM_EPS = 1e-5   # args.norm_eps
PRIOR_EPS = 1e-5  # AttentionPrior.eps
BATCH = 2
SEQLEN = 8

# packed weight layout (per layer): [wq|wk|wv](3*DIM) [wo](DIM) [w1|w3](2*DIM) [w2](DIM)
LAYER_COLS = 7 * DIM
TOTAL_COLS = N_LAYERS * LAYER_COLS + VOCAB            # + final output projection


# --------------------------- fused Pallas kernel -----------------------------
def _fused_forward_kernel(x_ref, mask_ref, w_ref, norm_ref, out_ref, *,
                          n_layers, n_heads, head_dim, dim, vocab,
                          norm_eps, scale):
    """Whole forward for the folded batch, everything resident in VMEM.

    x_ref:    (B*S, DIM)        f32  token embeddings, batch folded into rows
    mask_ref: (H, B*S, B*S)     f32  causal + prior, -inf on cross-batch blocks
    w_ref:    (DIM, TOTAL_COLS) bf16 packed weights (see layout above)
    norm_ref: (2*L+1, DIM)      f32  [attn_norm_l, ffn_norm_l]*L + final_norm
    out_ref:  (B*S, 1)          i32  argmax token ids
    """
    bf16 = jnp.bfloat16
    f32 = jnp.float32

    def rms(x, w_row):                                   # f32 elementwise path
        var = jnp.mean(x * x, axis=-1, keepdims=True)
        return x * jax.lax.rsqrt(var + norm_eps) * w_row

    h = x_ref[...]                                       # (BS, DIM) f32

    for l in range(n_layers):
        base = l * 7 * dim

        # ---------------- attention block ----------------
        xn = rms(h, norm_ref[2 * l:2 * l + 1, :])        # (BS, DIM)
        wqkv = w_ref[:, base:base + 3 * dim]             # (DIM, 3*DIM) bf16
        qkv = jnp.dot(xn.astype(bf16), wqkv,
                      preferred_element_type=f32)        # (BS, 3*DIM) f32

        heads_out = []
        for hh in range(n_heads):
            lo = hh * head_dim
            q_h = qkv[:, lo:lo + head_dim].astype(bf16)                  # (BS, D)
            k_h = qkv[:, dim + lo:dim + lo + head_dim].astype(bf16)
            v_h = qkv[:, 2 * dim + lo:2 * dim + lo + head_dim].astype(bf16)

            s = jnp.einsum('qd,kd->qk', q_h, k_h,
                           preferred_element_type=f32) * scale           # (BS, BS)
            s = s + mask_ref[hh]            # causal + prior, cross-batch = -inf
            m = jnp.max(s, axis=-1, keepdims=True)
            p = jnp.exp(s - m)
            p = p * pl.reciprocal(jnp.sum(p, axis=-1, keepdims=True),
                                  approx=True)
            heads_out.append(jnp.dot(p.astype(bf16), v_h,
                                     preferred_element_type=f32))        # (BS, D)

        # single fused Wo projection instead of 4 sliced matmuls
        o = jnp.concatenate(heads_out, axis=-1)                          # (BS, DIM)
        wo = w_ref[:, base + 3 * dim:base + 4 * dim]                     # (DIM, DIM)
        h = h + jnp.dot(o.astype(bf16), wo, preferred_element_type=f32)

        # ---------------- feed-forward block ----------------
        hn = rms(h, norm_ref[2 * l + 1:2 * l + 2, :])
        w13 = w_ref[:, base + 4 * dim:base + 6 * dim]                    # (DIM, 2*DIM)
        h13 = jnp.dot(hn.astype(bf16), w13, preferred_element_type=f32)  # (BS, 2*DIM)
        h1 = h13[:, :dim]                                # hidden_dim == dim
        h3 = h13[:, dim:]
        g = h1 * jax.nn.sigmoid(h1) * h3                 # SiLU(w1 x) * (w3 x), f32
        w2 = w_ref[:, base + 6 * dim:base + 7 * dim]
        h = h + jnp.dot(g.astype(bf16), w2, preferred_element_type=f32)

    # -------------- final norm + output projection + argmax ------------------
    hn = rms(h, norm_ref[2 * n_layers:2 * n_layers + 1, :])
    out_w = w_ref[:, n_layers * 7 * dim:n_layers * 7 * dim + vocab]      # (DIM, VOCAB)
    logits = jnp.dot(hn.astype(bf16), out_w, preferred_element_type=f32) # (BS, VOCAB)
    mx = jnp.max(logits, axis=-1, keepdims=True)
    iota = jax.lax.broadcasted_iota(jnp.int32, logits.shape, 1).astype(f32)
    idx = jnp.min(jnp.where(logits == mx, iota, float(vocab)),
                  axis=-1, keepdims=True)                                # (BS, 1)
    out_ref[...] = idx.astype(jnp.int32)


def bat_forward_pallas(params, h_emb, mask):
    """h_emb: (B, S, DIM); mask: (H, B*S, B*S). Returns (B, S) int32."""
    B, S, _ = h_emb.shape
    x2d = h_emb.reshape(B * S, DIM)                      # fold batch into rows
    kernel = partial(_fused_forward_kernel,
                     n_layers=N_LAYERS, n_heads=N_HEADS, head_dim=HEAD_DIM,
                     dim=DIM, vocab=VOCAB, norm_eps=NORM_EPS,
                     scale=1.0 / math.sqrt(HEAD_DIM))
    vmem = lambda: pl.BlockSpec(memory_space=pltpu.MemorySpace.VMEM)
    out = pl.pallas_call(
        kernel,
        in_specs=[vmem(), vmem(), vmem(), vmem()],       # whole arrays in VMEM
        out_specs=vmem(),
        out_shape=jax.ShapeDtypeStruct((B * S, 1), jnp.int32),
    )(x2d, mask, params['w_packed'], params['norms'])
    # TODO(synk): lane-contiguous (1, B*S) output store skipped — it needs a
    #             sublane->lane relayout in-kernel; the (16,1) store is tiny.
    return out[:, 0].reshape(B, S)


# --------------------------- plain-JAX glue ----------------------------------
def get_slopes(n):
    def pow2(n):
        start = 2 ** (-2 ** (-(math.log2(n) - 3)))
        return [start * start ** i for i in range(n)]
    if math.log2(n).is_integer():
        return pow2(n)
    cp = 2 ** math.floor(math.log2(n))
    return pow2(cp) + get_slopes(2 * cp)[0::2][:n - cp]


def attention_prior(scale_log, shape_p, loc_p, seq_len, start_pos=0):
    # Matches AttentionPrior.forward
    q_pos = jnp.arange(seq_len, dtype=jnp.float32) + start_pos
    k_pos = jnp.arange(seq_len + start_pos, dtype=jnp.float32)
    dist = (k_pos[None, :] - q_pos[:, None]).reshape(1, 1, seq_len,
                                                     seq_len + start_pos)
    loc = jnp.exp(loc_p) - jnp.exp(-loc_p)
    z = (dist - loc) * jnp.exp(scale_log)
    return -(jnp.abs(z) + PRIOR_EPS) ** shape_p          # (1, H, S, S)


def init_params(key):
    def w(k, shape, scale=0.02):
        return jax.random.normal(k, shape, dtype=jnp.float32) * scale

    keys = jax.random.split(key, 2 + N_LAYERS)
    tok_emb = w(keys[0], (VOCAB, DIM))
    out_w = w(keys[1], (DIM, VOCAB))

    cols = []
    for i in range(N_LAYERS):
        lk = jax.random.split(keys[2 + i], 7)
        wq = w(lk[0], (DIM, DIM))
        wk = w(lk[1], (DIM, DIM))
        wv = w(lk[2], (DIM, DIM))
        wo = w(lk[3], (DIM, DIM))
        w1 = w(lk[4], (DIM, DIM))                        # hidden_dim = dim
        w3 = w(lk[5], (DIM, DIM))
        w2_ = w(lk[6], (DIM, DIM))
        cols += [wq, wk, wv, wo, w1, w3, w2_]            # 7*DIM columns / layer
    cols.append(out_w)
    w_packed = jnp.concatenate(cols, axis=1).astype(jnp.bfloat16)
    assert w_packed.shape == (DIM, TOTAL_COLS)

    params = {
        'tok_emb': tok_emb,
        'w_packed': w_packed,                            # (DIM, 512) bf16
        'norms': jnp.ones((2 * N_LAYERS + 1, DIM), jnp.float32),
        # AttentionPrior params (scale_init='slope', shape_init=1, loc_init=0)
        'prior_scale': jnp.log(jnp.asarray(get_slopes(N_HEADS),
                                           dtype=jnp.float32)
                               ).reshape(1, N_HEADS, 1, 1),
        'prior_shape': jnp.ones((1, N_HEADS, 1, 1), jnp.float32),
        'prior_loc': jnp.zeros((1, N_HEADS, 1, 1), jnp.float32),
    }
    return params


@jax.jit
def bat_transformer_forward(params, tokens):
    # Single chunk (seq_batch_size=None, start_pos=0); return_logits=False ->
    # argmax over vocab, matching BATransformer.forward defaults.
    B, S = tokens.shape
    h = params['tok_emb'][tokens]                        # (B, S, DIM)

    # causal mask + global AttentionPrior per head  ->  (H, S, S)
    row = jnp.arange(S)[:, None]
    col = jnp.arange(S)[None, :]
    causal = jnp.where(col > row, -jnp.inf, 0.0).astype(jnp.float32)
    prior = attention_prior(params['prior_scale'], params['prior_shape'],
                            params['prior_loc'], S, 0)[0]   # (H, S, S)
    per_head = causal[None] + prior                          # (H, S, S)

    # expand to the batch-folded (H, B*S, B*S) mask: -inf across batch rows
    s_idx = jnp.arange(B * S) % S
    b_idx = jnp.arange(B * S) // S
    inner = per_head[:, s_idx[:, None], s_idx[None, :]]      # (H, BS, BS)
    same_b = (b_idx[:, None] == b_idx[None, :])[None]        # (1, BS, BS)
    mask = jnp.where(same_b, inner, -jnp.inf)

    return bat_forward_pallas(params, h, mask)               # (B, S) int32

# TODO(synk): KV-cache growth / start_pos>0 chunked decoding path not modeled;
#             this implements the default full-sequence (start_pos=0) forward.
# TODO(synk): fully block-diagonal single-softmax (64x64) attention needs a
#             (B*S, H*D)<->(B*S*H, D) minor-dim reshape that Mosaic does not
#             reliably lower at these shapes; per-head form kept for safety.


if __name__ == "__main__":
    key = jax.random.PRNGKey(0)
    pkey, tkey = jax.random.split(key)
    params = init_params(pkey)
    tokens = jax.random.randint(tkey, (BATCH, SEQLEN), 0, VOCAB,
                                dtype=jnp.int32)
    out = bat_transformer_forward(params, tokens)
    jax.block_until_ready(out)
    assert out.shape == (BATCH, SEQLEN)
    print("KERNEL_OK")
</pallas_src>

<mosaic_0001>
module attributes {stable_mosaic.version = 11 : i64} {
  func.func @_fused_forward_kernel(%arg0: memref<16x32xf32, #tpu.memory_space<vmem>>, %arg1: memref<4x16x16xf32, #tpu.memory_space<vmem>>, %arg2: memref<32x512xbf16, #tpu.memory_space<vmem>>, %arg3: memref<5x32xf32, #tpu.memory_space<vmem>>, %arg4: memref<16x1xi32, #tpu.memory_space<vmem>>) attributes {dimension_semantics = [], scalar_prefetch = 0 : i64, scratch_operands = 0 : i64, tpu.core_type = #tpu.core_type<tc>} {
    %c0 = arith.constant 0 : index
    %c0_0 = arith.constant 0 : index
    %0 = vector.load %arg0[%c0, %c0_0] : memref<16x32xf32, #tpu.memory_space<vmem>>, vector<16x32xf32>
    %c0_1 = arith.constant 0 : index
    %c0_2 = arith.constant 0 : index
    %1 = vector.load %arg3[%c0_1, %c0_2] : memref<5x32xf32, #tpu.memory_space<vmem>>, vector<1x32xf32>
    %2 = arith.mulf %0, %0 : vector<16x32xf32>
    %cst = arith.constant dense<0.000000e+00> : vector<16xf32>
    %3 = vector.multi_reduction <add>, %2, %cst [1] : vector<16x32xf32> to vector<16xf32>
    %4 = vector.shape_cast %3 : vector<16xf32> to vector<16x1xf32>
    %cst_3 = arith.constant 3.200000e+01 : f32
    %5 = vector.broadcast %cst_3 : f32 to vector<16x1xf32>
    %6 = arith.divf %4, %5 : vector<16x1xf32>
    %cst_4 = arith.constant 9.99999974E-6 : f32
    %7 = vector.broadcast %cst_4 : f32 to vector<16x1xf32>
    %8 = arith.addf %6, %7 : vector<16x1xf32>
    %9 = math.rsqrt %8 : vector<16x1xf32>
    %10 = vector.broadcast %9 : vector<16x1xf32> to vector<16x32xf32>
    %11 = arith.mulf %0, %10 : vector<16x32xf32>
    %12 = vector.broadcast %1 : vector<1x32xf32> to vector<16x32xf32>
    %13 = arith.mulf %11, %12 : vector<16x32xf32>
    %c0_5 = arith.constant 0 : index
    %c0_6 = arith.constant 0 : index
    %14 = vector.load %arg2[%c0_5, %c0_6] : memref<32x512xbf16, #tpu.memory_space<vmem>>, vector<32x96xbf16>
    %15 = arith.truncf %13 : vector<16x32xf32> to vector<16x32xbf16>
    %cst_7 = arith.constant dense<0.000000e+00> : vector<16x96xf32>
    %16 = tpu.matmul %15, %14, %cst_7 {dimension_numbers = #tpu.dot_dimension_numbers<[1], [0], [0], [1], [0, 0, 1, 1], [], []>} : vector<16x32xbf16>, vector<32x96xbf16>, vector<16x96xf32> -> vector<16x96xf32>
    %17 = vector.extract_strided_slice %16 {offsets = [0, 0], sizes = [16, 8], strides = [1, 1]} : vector<16x96xf32> to vector<16x8xf32>
    %18 = arith.truncf %17 : vector<16x8xf32> to vector<16x8xbf16>
    %19 = vector.extract_strided_slice %16 {offsets = [0, 32], sizes = [16, 8], strides = [1, 1]} : vector<16x96xf32> to vector<16x8xf32>
    %20 = arith.truncf %19 : vector<16x8xf32> to vector<16x8xbf16>
    %21 = vector.extract_strided_slice %16 {offsets = [0, 64], sizes = [16, 8], strides = [1, 1]} : vector<16x96xf32> to vector<16x8xf32>
    %22 = arith.truncf %21 : vector<16x8xf32> to vector<16x8xbf16>
    "tpu.trace_start"() <{level = 10 : i32, message = "qd,kd->qk"}> : () -> ()
    %cst_8 = arith.constant dense<0.000000e+00> : vector<16x16xf32>
    %23 = tpu.matmul %18, %20, %cst_8 {dimension_numbers = #tpu.dot_dimension_numbers<[1], [1], [0], [0], [0, 0, 1, 0], [], []>} : vector<16x8xbf16>, vector<16x8xbf16>, vector<16x16xf32> -> vector<16x16xf32>
    "tpu.trace_stop"() : () -> ()
    %cst_9 = arith.constant 0.353553385 : f32
    %24 = vector.broadcast %cst_9 : f32 to vector<16x16xf32>
    %25 = arith.mulf %23, %24 : vector<16x16xf32>
    %c0_10 = arith.constant 0 : index
    %c0_11 = arith.constant 0 : index
    %c0_12 = arith.constant 0 : index
    %26 = vector.load %arg1[%c0_10, %c0_11, %c0_12] : memref<4x16x16xf32, #tpu.memory_space<vmem>>, vector<1x16x16xf32>
    %27 = vector.shape_cast %26 : vector<1x16x16xf32> to vector<16x16xf32>
    %28 = arith.addf %25, %27 : vector<16x16xf32>
    %cst_13 = arith.constant dense<0xFF800000> : vector<16xf32>
    %29 = vector.multi_reduction <maximumf>, %28, %cst_13 [1] : vector<16x16xf32> to vector<16xf32>
    %30 = vector.shape_cast %29 : vector<16xf32> to vector<16x1xf32>
    %31 = vector.broadcast %30 : vector<16x1xf32> to vector<16x16xf32>
    %32 = arith.subf %28, %31 : vector<16x16xf32>
    %33 = math.exp %32 : vector<16x16xf32>
    %cst_14 = arith.constant dense<0.000000e+00> : vector<16xf32>
    %34 = vector.multi_reduction <add>, %33, %cst_14 [1] : vector<16x16xf32> to vector<16xf32>
    %35 = vector.shape_cast %34 : vector<16xf32> to vector<16x1xf32>
    %36 = tpu.reciprocal %35 {approx = true} : vector<16x1xf32> -> vector<16x1xf32>
    %37 = vector.broadcast %36 : vector<16x1xf32> to vector<16x16xf32>
    %38 = arith.mulf %33, %37 : vector<16x16xf32>
    %39 = arith.truncf %38 : vector<16x16xf32> to vector<16x16xbf16>
    %cst_15 = arith.constant dense<0.000000e+00> : vector<16x8xf32>
    %40 = tpu.matmul %39, %22, %cst_15 {dimension_numbers = #tpu.dot_dimension_numbers<[1], [0], [0], [1], [0, 0, 1, 1], [], []>} : vector<16x16xbf16>, vector<16x8xbf16>, vector<16x8xf32> -> vector<16x8xf32>
    %41 = vector.extract_strided_slice %16 {offsets = [0, 8], sizes = [16, 8], strides = [1, 1]} : vector<16x96xf32> to vector<16x8xf32>
    %42 = arith.truncf %41 : vector<16x8xf32> to vector<16x8xbf16>
    %43 = vector.extract_strided_slice %16 {offsets = [0, 40], sizes = [16, 8], strides = [1, 1]} : vector<16x96xf32> to vector<16x8xf32>
    %44 = arith.truncf %43 : vector<16x8xf32> to vector<16x8xbf16>
    %45 = vector.extract_strided_slice %16 {offsets = [0, 72], sizes = [16, 8], strides = [1, 1]} : vector<16x96xf32> to vector<16x8xf32>
    %46 = arith.truncf %45 : vector<16x8xf32> to vector<16x8xbf16>
    "tpu.trace_start"() <{level = 10 : i32, message = "qd,kd->qk"}> : () -> ()
    %cst_16 = arith.constant dense<0.000000e+00> : vector<16x16xf32>
    %47 = tpu.matmul %42, %44, %cst_16 {dimension_numbers = #tpu.dot_dimension_numbers<[1], [1], [0], [0], [0, 0, 1, 0], [], []>} : vector<16x8xbf16>, vector<16x8xbf16>, vector<16x16xf32> -> vector<16x16xf32>
    "tpu.trace_stop"() : () -> ()
    %cst_17 = arith.constant 0.353553385 : f32
    %48 = vector.broadcast %cst_17 : f32 to vector<16x16xf32>
    %49 = arith.mulf %47, %48 : vector<16x16xf32>
    %c1 = arith.constant 1 : index
    %c0_18 = arith.constant 0 : index
    %c0_19 = arith.constant 0 : index
    %50 = vector.load %arg1[%c1, %c0_18, %c0_19] : memref<4x16x16xf32, #tpu.memory_space<vmem>>, vector<1x16x16xf32>
    %51 = vector.shape_cast %50 : vector<1x16x16xf32> to vector<16x16xf32>
    %52 = arith.addf %49, %51 : vector<16x16xf32>
    %cst_20 = arith.constant dense<0xFF800000> : vector<16xf32>
    %53 = vector.multi_reduction <maximumf>, %52, %cst_20 [1] : vector<16x16xf32> to vector<16xf32>
    %54 = vector.shape_cast %53 : vector<16xf32> to vector<16x1xf32>
    %55 = vector.broadcast %54 : vector<16x1xf32> to vector<16x16xf32>
    %56 = arith.subf %52, %55 : vector<16x16xf32>
    %57 = math.exp %56 : vector<16x16xf32>
    %cst_21 = arith.constant dense<0.000000e+00> : vector<16xf32>
    %58 = vector.multi_reduction <add>, %57, %cst_21 [1] : vector<16x16xf32> to vector<16xf32>
    %59 = vector.shape_cast %58 : vector<16xf32> to vector<16x1xf32>
    %60 = tpu.reciprocal %59 {approx = true} : vector<16x1xf32> -> vector<16x1xf32>
    %61 = vector.broadcast %60 : vector<16x1xf32> to vector<16x16xf32>
    %62 = arith.mulf %57, %61 : vector<16x16xf32>
    %63 = arith.truncf %62 : vector<16x16xf32> to vector<16x16xbf16>
    %cst_22 = arith.constant dense<0.000000e+00> : vector<16x8xf32>
    %64 = tpu.matmul %63, %46, %cst_22 {dimension_numbers = #tpu.dot_dimension_numbers<[1], [0], [0], [1], [0, 0, 1, 1], [], []>} : vector<16x16xbf16>, vector<16x8xbf16>, vector<16x8xf32> -> vector<16x8xf32>
    %65 = vector.extract_strided_slice %16 {offsets = [0, 16], sizes = [16, 8], strides = [1, 1]} : vector<16x96xf32> to vector<16x8xf32>
    %66 = arith.truncf %65 : vector<16x8xf32> to vector<16x8xbf16>
    %67 = vector.extract_strided_slice %16 {offsets = [0, 48], sizes = [16, 8], strides = [1, 1]} : vector<16x96xf32> to vector<16x8xf32>
    %68 = arith.truncf %67 : vector<16x8xf32> to vector<16x8xbf16>
    %69 = vector.extract_strided_slice %16 {offsets = [0, 80], sizes = [16, 8], strides = [1, 1]} : vector<16x96xf32> to vector<16x8xf32>
    %70 = arith.truncf %69 : vector<16x8xf32> to vector<16x8xbf16>
    "tpu.trace_start"() <{level = 10 : i32, message = "qd,kd->qk"}> : () -> ()
    %cst_23 = arith.constant dense<0.000000e+00> : vector<16x16xf32>
    %71 = tpu.matmul %66, %68, %cst_23 {dimension_numbers = #tpu.dot_dimension_numbers<[1], [1], [0], [0], [0, 0, 1, 0], [], []>} : vector<16x8xbf16>, vector<16x8xbf16>, vector<16x16xf32> -> vector<16x16xf32>
    "tpu.trace_stop"() : () -> ()
    %cst_24 = arith.constant 0.353553385 : f32
    %72 = vector.broadcast %cst_24 : f32 to vector<16x16xf32>
    %73 = arith.mulf %71, %72 : vector<16x16xf32>
    %c2 = arith.constant 2 : index
    %c0_25 = arith.constant 0 : index
    %c0_26 = arith.constant 0 : index
    %74 = vector.load %arg1[%c2, %c0_25, %c0_26] : memref<4x16x16xf32, #tpu.memory_space<vmem>>, vector<1x16x16xf32>
    %75 = vector.shape_cast %74 : vector<1x16x16xf32> to vector<16x16xf32>
    %76 = arith.addf %73, %75 : vector<16x16xf32>
    %cst_27 = arith.constant dense<0xFF800000> : vector<16xf32>
    %77 = vector.multi_reduction <maximumf>, %76, %cst_27 [1] : vector<16x16xf32> to vector<16xf32>
    %78 = vector.shape_cast %77 : vector<16xf32> to vector<16x1xf32>
    %79 = vector.broadcast %78 : vector<16x1xf32> to vector<16x16xf32>
    %80 = arith.subf %76, %79 : vector<16x16xf32>
    %81 = math.exp %80 : vector<16x16xf32>
    %cst_28 = arith.constant dense<0.000000e+00> : vector<16xf32>
    %82 = vector.multi_reduction <add>, %81, %cst_28 [1] : vector<16x16xf32> to vector<16xf32>
    %83 = vector.shape_cast %82 : vector<16xf32> to vector<16x1xf32>
    %84 = tpu.reciprocal %83 {approx = true} : vector<16x1xf32> -> vector<16x1xf32>
    %85 = vector.broadcast %84 : vector<16x1xf32> to vector<16x16xf32>
    %86 = arith.mulf %81, %85 : vector<16x16xf32>
    %87 = arith.truncf %86 : vector<16x16xf32> to vector<16x16xbf16>
    %cst_29 = arith.constant dense<0.000000e+00> : vector<16x8xf32>
    %88 = tpu.matmul %87, %70, %cst_29 {dimension_numbers = #tpu.dot_dimension_numbers<[1], [0], [0], [1], [0, 0, 1, 1], [], []>} : vector<16x16xbf16>, vector<16x8xbf16>, vector<16x8xf32> -> vector<16x8xf32>
    %89 = vector.extract_strided_slice %16 {offsets = [0, 24], sizes = [16, 8], strides = [1, 1]} : vector<16x96xf32> to vector<16x8xf32>
    %90 = arith.truncf %89 : vector<16x8xf32> to vector<16x8xbf16>
    %91 = vector.extract_strided_slice %16 {offsets = [0, 56], sizes = [16, 8], strides = [1, 1]} : vector<16x96xf32> to vector<16x8xf32>
    %92 = arith.truncf %91 : vector<16x8xf32> to vector<16x8xbf16>
    %93 = vector.extract_strided_slice %16 {offsets = [0, 88], sizes = [16, 8], strides = [1, 1]} : vector<16x96xf32> to vector<16x8xf32>
    %94 = arith.truncf %93 : vector<16x8xf32> to vector<16x8xbf16>
    "tpu.trace_start"() <{level = 10 : i32, message = "qd,kd->qk"}> : () -> ()
    %cst_30 = arith.constant dense<0.000000e+00> : vector<16x16xf32>
    %95 = tpu.matmul %90, %92, %cst_30 {dimension_numbers = #tpu.dot_dimension_numbers<[1], [1], [0], [0], [0, 0, 1, 0], [], []>} : vector<16x8xbf16>, vector<16x8xbf16>, vector<16x16xf32> -> vector<16x16xf32>
    "tpu.trace_stop"() : () -> ()
    %cst_31 = arith.constant 0.353553385 : f32
    %96 = vector.broadcast %cst_31 : f32 to vector<16x16xf32>
    %97 = arith.mulf %95, %96 : vector<16x16xf32>
    %c3 = arith.constant 3 : index
    %c0_32 = arith.constant 0 : index
    %c0_33 = arith.constant 0 : index
    %98 = vector.load %arg1[%c3, %c0_32, %c0_33] : memref<4x16x16xf32, #tpu.memory_space<vmem>>, vector<1x16x16xf32>
    %99 = vector.shape_cast %98 : vector<1x16x16xf32> to vector<16x16xf32>
    %100 = arith.addf %97, %99 : vector<16x16xf32>
    %cst_34 = arith.constant dense<0xFF800000> : vector<16xf32>
    %101 = vector.multi_reduction <maximumf>, %100, %cst_34 [1] : vector<16x16xf32> to vector<16xf32>
    %102 = vector.shape_cast %101 : vector<16xf32> to vector<16x1xf32>
    %103 = vector.broadcast %102 : vector<16x1xf32> to vector<16x16xf32>
    %104 = arith.subf %100, %103 : vector<16x16xf32>
    %105 = math.exp %104 : vector<16x16xf32>
    %cst_35 = arith.constant dense<0.000000e+00> : vector<16xf32>
    %106 = vector.multi_reduction <add>, %105, %cst_35 [1] : vector<16x16xf32> to vector<16xf32>
    %107 = vector.shape_cast %106 : vector<16xf32> to vector<16x1xf32>
    %108 = tpu.reciprocal %107 {approx = true} : vector<16x1xf32> -> vector<16x1xf32>
    %109 = vector.broadcast %108 : vector<16x1xf32> to vector<16x16xf32>
    %110 = arith.mulf %105, %109 : vector<16x16xf32>
    %111 = arith.truncf %110 : vector<16x16xf32> to vector<16x16xbf16>
    %cst_36 = arith.constant dense<0.000000e+00> : vector<16x8xf32>
    %112 = tpu.matmul %111, %94, %cst_36 {dimension_numbers = #tpu.dot_dimension_numbers<[1], [0], [0], [1], [0, 0, 1, 1], [], []>} : vector<16x16xbf16>, vector<16x8xbf16>, vector<16x8xf32> -> vector<16x8xf32>
    %113 = tpu.concatenate %40, %64, %88, %112 in 1 : vector<16x8xf32>, vector<16x8xf32>, vector<16x8xf32>, vector<16x8xf32> -> vector<16x32xf32>
    %c0_37 = arith.constant 0 : index
    %c96 = arith.constant 96 : index
    %114 = vector.load %arg2[%c0_37, %c96] : memref<32x512xbf16, #tpu.memory_space<vmem>>, vector<32x32xbf16>
    %115 = arith.truncf %113 : vector<16x32xf32> to vector<16x32xbf16>
    %cst_38 = arith.constant dense<0.000000e+00> : vector<16x32xf32>
    %116 = tpu.matmul %115, %114, %cst_38 {dimension_numbers = #tpu.dot_dimension_numbers<[1], [0], [0], [1], [0, 0, 1, 1], [], []>} : vector<16x32xbf16>, vector<32x32xbf16>, vector<16x32xf32> -> vector<16x32xf32>
    %117 = arith.addf %0, %116 : vector<16x32xf32>
    %c1_39 = arith.constant 1 : index
    %c0_40 = arith.constant 0 : index
    %118 = vector.load %arg3[%c1_39, %c0_40] : memref<5x32xf32, #tpu.memory_space<vmem>>, vector<1x32xf32>
    %119 = arith.mulf %117, %117 : vector<16x32xf32>
    %cst_41 = arith.constant dense<0.000000e+00> : vector<16xf32>
    %120 = vector.multi_reduction <add>, %119, %cst_41 [1] : vector<16x32xf32> to vector<16xf32>
    %121 = vector.shape_cast %120 : vector<16xf32> to vector<16x1xf32>
    %cst_42 = arith.constant 3.200000e+01 : f32
    %122 = vector.broadcast %cst_42 : f32 to vector<16x1xf32>
    %123 = arith.divf %121, %122 : vector<16x1xf32>
    %cst_43 = arith.constant 9.99999974E-6 : f32
    %124 = vector.broadcast %cst_43 : f32 to vector<16x1xf32>
    %125 = arith.addf %123, %124 : vector<16x1xf32>
    %126 = math.rsqrt %125 : vector<16x1xf32>
    %127 = vector.broadcast %126 : vector<16x1xf32> to vector<16x32xf32>
    %128 = arith.mulf %117, %127 : vector<16x32xf32>
    %129 = vector.broadcast %118 : vector<1x32xf32> to vector<16x32xf32>
    %130 = arith.mulf %128, %129 : vector<16x32xf32>
    %c0_44 = arith.constant 0 : index
    %c128 = arith.constant 128 : index
    %131 = vector.load %arg2[%c0_44, %c128] : memref<32x512xbf16, #tpu.memory_space<vmem>>, vector<32x64xbf16>
    %132 = arith.truncf %130 : vector<16x32xf32> to vector<16x32xbf16>
    %cst_45 = arith.constant dense<0.000000e+00> : vector<16x64xf32>
    %133 = tpu.matmul %132, %131, %cst_45 {dimension_numbers = #tpu.dot_dimension_numbers<[1], [0], [0], [1], [0, 0, 1, 1], [], []>} : vector<16x32xbf16>, vector<32x64xbf16>, vector<16x64xf32> -> vector<16x64xf32>
    %134 = vector.extract_strided_slice %133 {offsets = [0, 0], sizes = [16, 32], strides = [1, 1]} : vector<16x64xf32> to vector<16x32xf32>
    %135 = vector.extract_strided_slice %133 {offsets = [0, 32], sizes = [16, 32], strides = [1, 1]} : vector<16x64xf32> to vector<16x32xf32>
    %136 = arith.negf %134 : vector<16x32xf32>
    %137 = math.exp %136 : vector<16x32xf32>
    %cst_46 = arith.constant 1.000000e+00 : f32
    %138 = vector.broadcast %cst_46 : f32 to vector<16x32xf32>
    %139 = arith.addf %138, %137 : vector<16x32xf32>
    %140 = arith.divf %138, %139 : vector<16x32xf32>
    %141 = arith.mulf %134, %140 : vector<16x32xf32>
    %142 = arith.mulf %141, %135 : vector<16x32xf32>
    %c0_47 = arith.constant 0 : index
    %c192 = arith.constant 192 : index
    %143 = vector.load %arg2[%c0_47, %c192] : memref<32x512xbf16, #tpu.memory_space<vmem>>, vector<32x32xbf16>
    %144 = arith.truncf %142 : vector<16x32xf32> to vector<16x32xbf16>
    %cst_48 = arith.constant dense<0.000000e+00> : vector<16x32xf32>
    %145 = tpu.matmul %144, %143, %cst_48 {dimension_numbers = #tpu.dot_dimension_numbers<[1], [0], [0], [1], [0, 0, 1, 1], [], []>} : vector<16x32xbf16>, vector<32x32xbf16>, vector<16x32xf32> -> vector<16x32xf32>
    %146 = arith.addf %117, %145 : vector<16x32xf32>
    %c2_49 = arith.constant 2 : index
    %c0_50 = arith.constant 0 : index
    %147 = vector.load %arg3[%c2_49, %c0_50] : memref<5x32xf32, #tpu.memory_space<vmem>>, vector<1x32xf32>
    %148 = arith.mulf %146, %146 : vector<16x32xf32>
    %cst_51 = arith.constant dense<0.000000e+00> : vector<16xf32>
    %149 = vector.multi_reduction <add>, %148, %cst_51 [1] : vector<16x32xf32> to vector<16xf32>
    %150 = vector.shape_cast %149 : vector<16xf32> to vector<16x1xf32>
    %cst_52 = arith.constant 3.200000e+01 : f32
    %151 = vector.broadcast %cst_52 : f32 to vector<16x1xf32>
    %152 = arith.divf %150, %151 : vector<16x1xf32>
    %cst_53 = arith.constant 9.99999974E-6 : f32
    %153 = vector.broadcast %cst_53 : f32 to vector<16x1xf32>
    %154 = arith.addf %152, %153 : vector<16x1xf32>
    %155 = math.rsqrt %154 : vector<16x1xf32>
    %156 = vector.broadcast %155 : vector<16x1xf32> to vector<16x32xf32>
    %157 = arith.mulf %146, %156 : vector<16x32xf32>
    %158 = vector.broadcast %147 : vector<1x32xf32> to vector<16x32xf32>
    %159 = arith.mulf %157, %158 : vector<16x32xf32>
    %c0_54 = arith.constant 0 : index
    %c224 = arith.constant 224 : index
    %160 = vector.load %arg2[%c0_54, %c224] : memref<32x512xbf16, #tpu.memory_space<vmem>>, vector<32x96xbf16>
    %161 = arith.truncf %159 : vector<16x32xf32> to vector<16x32xbf16>
    %cst_55 = arith.constant dense<0.000000e+00> : vector<16x96xf32>
    %162 = tpu.matmul %161, %160, %cst_55 {dimension_numbers = #tpu.dot_dimension_numbers<[1], [0], [0], [1], [0, 0, 1, 1], [], []>} : vector<16x32xbf16>, vector<32x96xbf16>, vector<16x96xf32> -> vector<16x96xf32>
    %163 = vector.extract_strided_slice %162 {offsets = [0, 0], sizes = [16, 8], strides = [1, 1]} : vector<16x96xf32> to vector<16x8xf32>
    %164 = arith.truncf %163 : vector<16x8xf32> to vector<16x8xbf16>
    %165 = vector.extract_strided_slice %162 {offsets = [0, 32], sizes = [16, 8], strides = [1, 1]} : vector<16x96xf32> to vector<16x8xf32>
    %166 = arith.truncf %165 : vector<16x8xf32> to vector<16x8xbf16>
    %167 = vector.extract_strided_slice %162 {offsets = [0, 64], sizes = [16, 8], strides = [1, 1]} : vector<16x96xf32> to vector<16x8xf32>
    %168 = arith.truncf %167 : vector<16x8xf32> to vector<16x8xbf16>
    "tpu.trace_start"() <{level = 10 : i32, message = "qd,kd->qk"}> : () -> ()
    %cst_56 = arith.constant dense<0.000000e+00> : vector<16x16xf32>
    %169 = tpu.matmul %164, %166, %cst_56 {dimension_numbers = #tpu.dot_dimension_numbers<[1], [1], [0], [0], [0, 0, 1, 0], [], []>} : vector<16x8xbf16>, vector<16x8xbf16>, vector<16x16xf32> -> vector<16x16xf32>
    "tpu.trace_stop"() : () -> ()
    %cst_57 = arith.constant 0.353553385 : f32
    %170 = vector.broadcast %cst_57 : f32 to vector<16x16xf32>
    %171 = arith.mulf %169, %170 : vector<16x16xf32>
    %c0_58 = arith.constant 0 : index
    %c0_59 = arith.constant 0 : index
    %c0_60 = arith.constant 0 : index
    %172 = vector.load %arg1[%c0_58, %c0_59, %c0_60] : memref<4x16x16xf32, #tpu.memory_space<vmem>>, vector<1x16x16xf32>
    %173 = vector.shape_cast %172 : vector<1x16x16xf32> to vector<16x16xf32>
    %174 = arith.addf %171, %173 : vector<16x16xf32>
    %cst_61 = arith.constant dense<0xFF800000> : vector<16xf32>
    %175 = vector.multi_reduction <maximumf>, %174, %cst_61 [1] : vector<16x16xf32> to vector<16xf32>
    %176 = vector.shape_cast %175 : vector<16xf32> to vector<16x1xf32>
    %177 = vector.broadcast %176 : vector<16x1xf32> to vector<16x16xf32>
    %178 = arith.subf %174, %177 : vector<16x16xf32>
    %179 = math.exp %178 : vector<16x16xf32>
    %cst_62 = arith.constant dense<0.000000e+00> : vector<16xf32>
    %180 = vector.multi_reduction <add>, %179, %cst_62 [1] : vector<16x16xf32> to vector<16xf32>
    %181 = vector.shape_cast %180 : vector<16xf32> to vector<16x1xf32>
    %182 = tpu.reciprocal %181 {approx = true} : vector<16x1xf32> -> vector<16x1xf32>
    %183 = vector.broadcast %182 : vector<16x1xf32> to vector<16x16xf32>
    %184 = arith.mulf %179, %183 : vector<16x16xf32>
    %185 = arith.truncf %184 : vector<16x16xf32> to vector<16x16xbf16>
    %cst_63 = arith.constant dense<0.000000e+00> : vector<16x8xf32>
    %186 = tpu.matmul %185, %168, %cst_63 {dimension_numbers = #tpu.dot_dimension_numbers<[1], [0], [0], [1], [0, 0, 1, 1], [], []>} : vector<16x16xbf16>, vector<16x8xbf16>, vector<16x8xf32> -> vector<16x8xf32>
    %187 = vector.extract_strided_slice %162 {offsets = [0, 8], sizes = [16, 8], strides = [1, 1]} : vector<16x96xf32> to vector<16x8xf32>
    %188 = arith.truncf %187 : vector<16x8xf32> to vector<16x8xbf16>
    %189 = vector.extract_strided_slice %162 {offsets = [0, 40], sizes = [16, 8], strides = [1, 1]} : vector<16x96xf32> to vector<16x8xf32>
    %190 = arith.truncf %189 : vector<16x8xf32> to vector<16x8xbf16>
    %191 = vector.extract_strided_slice %162 {offsets = [0, 72], sizes = [16, 8], strides = [1, 1]} : vector<16x96xf32> to vector<16x8xf32>
    %192 = arith.truncf %191 : vector<16x8xf32> to vector<16x8xbf16>
    "tpu.trace_start"() <{level = 10 : i32, message = "qd,kd->qk"}> : () -> ()
    %cst_64 = arith.constant dense<0.000000e+00> : vector<16x16xf32>
    %193 = tpu.matmul %188, %190, %cst_64 {dimension_numbers = #tpu.dot_dimension_numbers<[1], [1], [0], [0], [0, 0, 1, 0], [], []>} : vector<16x8xbf16>, vector<16x8xbf16>, vector<16x16xf32> -> vector<16x16xf32>
    "tpu.trace_stop"() : () -> ()
    %cst_65 = arith.constant 0.353553385 : f32
    %194 = vector.broadcast %cst_65 : f32 to vector<16x16xf32>
    %195 = arith.mulf %193, %194 : vector<16x16xf32>
    %c1_66 = arith.constant 1 : index
    %c0_67 = arith.constant 0 : index
    %c0_68 = arith.constant 0 : index
    %196 = vector.load %arg1[%c1_66, %c0_67, %c0_68] : memref<4x16x16xf32, #tpu.memory_space<vmem>>, vector<1x16x16xf32>
    %197 = vector.shape_cast %196 : vector<1x16x16xf32> to vector<16x16xf32>
    %198 = arith.addf %195, %197 : vector<16x16xf32>
    %cst_69 = arith.constant dense<0xFF800000> : vector<16xf32>
    %199 = vector.multi_reduction <maximumf>, %198, %cst_69 [1] : vector<16x16xf32> to vector<16xf32>
    %200 = vector.shape_cast %199 : vector<16xf32> to vector<16x1xf32>
    %201 = vector.broadcast %200 : vector<16x1xf32> to vector<16x16xf32>
    %202 = arith.subf %198, %201 : vector<16x16xf32>
    %203 = math.exp %202 : vector<16x16xf32>
    %cst_70 = arith.constant dense<0.000000e+00> : vector<16xf32>
    %204 = vector.multi_reduction <add>, %203, %cst_70 [1] : vector<16x16xf32> to vector<16xf32>
    %205 = vector.shape_cast %204 : vector<16xf32> to vector<16x1xf32>
    %206 = tpu.reciprocal %205 {approx = true} : vector<16x1xf32> -> vector<16x1xf32>
    %207 = vector.broadcast %206 : vector<16x1xf32> to vector<16x16xf32>
    %208 = arith.mulf %203, %207 : vector<16x16xf32>
    %209 = arith.truncf %208 : vector<16x16xf32> to vector<16x16xbf16>
    %cst_71 = arith.constant dense<0.000000e+00> : vector<16x8xf32>
    %210 = tpu.matmul %209, %192, %cst_71 {dimension_numbers = #tpu.dot_dimension_numbers<[1], [0], [0], [1], [0, 0, 1, 1], [], []>} : vector<16x16xbf16>, vector<16x8xbf16>, vector<16x8xf32> -> vector<16x8xf32>
    %211 = vector.extract_strided_slice %162 {offsets = [0, 16], sizes = [16, 8], strides = [1, 1]} : vector<16x96xf32> to vector<16x8xf32>
    %212 = arith.truncf %211 : vector<16x8xf32> to vector<16x8xbf16>
    %213 = vector.extract_strided_slice %162 {offsets = [0, 48], sizes = [16, 8], strides = [1, 1]} : vector<16x96xf32> to vector<16x8xf32>
    %214 = arith.truncf %213 : vector<16x8xf32> to vector<16x8xbf16>
    %215 = vector.extract_strided_slice %162 {offsets = [0, 80], sizes = [16, 8], strides = [1, 1]} : vector<16x96xf32> to vector<16x8xf32>
    %216 = arith.truncf %215 : vector<16x8xf32> to vector<16x8xbf16>
    "tpu.trace_start"() <{level = 10 : i32, message = "qd,kd->qk"}> : () -> ()
    %cst_72 = arith.constant dense<0.000000e+00> : vector<16x16xf32>
    %217 = tpu.matmul %212, %214, %cst_72 {dimension_numbers = #tpu.dot_dimension_numbers<[1], [1], [0], [0], [0, 0, 1, 0], [], []>} : vector<16x8xbf16>, vector<16x8xbf16>, vector<16x16xf32> -> vector<16x16xf32>
    "tpu.trace_stop"() : () -> ()
    %cst_73 = arith.constant 0.353553385 : f32
    %218 = vector.broadcast %cst_73 : f32 to vector<16x16xf32>
    %219 = arith.mulf %217, %218 : vector<16x16xf32>
    %c2_74 = arith.constant 2 : index
    %c0_75 = arith.constant 0 : index
    %c0_76 = arith.constant 0 : index
    %220 = vector.load %arg1[%c2_74, %c0_75, %c0_76] : memref<4x16x16xf32, #tpu.memory_space<vmem>>, vector<1x16x16xf32>
    %221 = vector.shape_cast %220 : vector<1x16x16xf32> to vector<16x16xf32>
    %222 = arith.addf %219, %221 : vector<16x16xf32>
    %cst_77 = arith.constant dense<0xFF800000> : vector<16xf32>
    %223 = vector.multi_reduction <maximumf>, %222, %cst_77 [1] : vector<16x16xf32> to vector<16xf32>
    %224 = vector.shape_cast %223 : vector<16xf32> to vector<16x1xf32>
    %225 = vector.broadcast %224 : vector<16x1xf32> to vector<16x16xf32>
    %226 = arith.subf %222, %225 : vector<16x16xf32>
    %227 = math.exp %226 : vector<16x16xf32>
    %cst_78 = arith.constant dense<0.000000e+00> : vector<16xf32>
    %228 = vector.multi_reduction <add>, %227, %cst_78 [1] : vector<16x16xf32> to vector<16xf32>
    %229 = vector.shape_cast %228 : vector<16xf32> to vector<16x1xf32>
    %230 = tpu.reciprocal %229 {approx = true} : vector<16x1xf32> -> vector<16x1xf32>
    %231 = vector.broadcast %230 : vector<16x1xf32> to vector<16x16xf32>
    %232 = arith.mulf %227, %231 : vector<16x16xf32>
    %233 = arith.truncf %232 : vector<16x16xf32> to vector<16x16xbf16>
    %cst_79 = arith.constant dense<0.000000e+00> : vector<16x8xf32>
    %234 = tpu.matmul %233, %216, %cst_79 {dimension_numbers = #tpu.dot_dimension_numbers<[1], [0], [0], [1], [0, 0, 1, 1], [], []>} : vector<16x16xbf16>, vector<16x8xbf16>, vector<16x8xf32> -> vector<16x8xf32>
    %235 = vector.extract_strided_slice %162 {offsets = [0, 24], sizes = [16, 8], strides = [1, 1]} : vector<16x96xf32> to vector<16x8xf32>
    %236 = arith.truncf %235 : vector<16x8xf32> to vector<16x8xbf16>
    %237 = vector.extract_strided_slice %162 {offsets = [0, 56], sizes = [16, 8], strides = [1, 1]} : vector<16x96xf32> to vector<16x8xf32>
    %238 = arith.truncf %237 : vector<16x8xf32> to vector<16x8xbf16>
    %239 = vector.extract_strided_slice %162 {offsets = [0, 88], sizes = [16, 8], strides = [1, 1]} : vector<16x96xf32> to vector<16x8xf32>
    %240 = arith.truncf %239 : vector<16x8xf32> to vector<16x8xbf16>
    "tpu.trace_start"() <{level = 10 : i32, message = "qd,kd->qk"}> : () -> ()
    %cst_80 = arith.constant dense<0.000000e+00> : vector<16x16xf32>
    %241 = tpu.matmul %236, %238, %cst_80 {dimension_numbers = #tpu.dot_dimension_numbers<[1], [1], [0], [0], [0, 0, 1, 0], [], []>} : vector<16x8xbf16>, vector<16x8xbf16>, vector<16x16xf32> -> vector<16x16xf32>
    "tpu.trace_stop"() : () -> ()
    %cst_81 = arith.constant 0.353553385 : f32
    %242 = vector.broadcast %cst_81 : f32 to vector<16x16xf32>
    %243 = arith.mulf %241, %242 : vector<16x16xf32>
    %c3_82 = arith.constant 3 : index
    %c0_83 = arith.constant 0 : index
    %c0_84 = arith.constant 0 : index
    %244 = vector.load %arg1[%c3_82, %c0_83, %c0_84] : memref<4x16x16xf32, #tpu.memory_space<vmem>>, vector<1x16x16xf32>
    %245 = vector.shape_cast %244 : vector<1x16x16xf32> to vector<16x16xf32>
    %246 = arith.addf %243, %245 : vector<16x16xf32>
    %cst_85 = arith.constant dense<0xFF800000> : vector<16xf32>
    %247 = vector.multi_reduction <maximumf>, %246, %cst_85 [1] : vector<16x16xf32> to vector<16xf32>
    %248 = vector.shape_cast %247 : vector<16xf32> to vector<16x1xf32>
    %249 = vector.broadcast %248 : vector<16x1xf32> to vector<16x16xf32>
    %250 = arith.subf %246, %249 : vector<16x16xf32>
    %251 = math.exp %250 : vector<16x16xf32>
    %cst_86 = arith.constant dense<0.000000e+00> : vector<16xf32>
    %252 = vector.multi_reduction <add>, %251, %cst_86 [1] : vector<16x16xf32> to vector<16xf32>
    %253 = vector.shape_cast %252 : vector<16xf32> to vector<16x1xf32>
    %254 = tpu.reciprocal %253 {approx = true} : vector<16x1xf32> -> vector<16x1xf32>
    %255 = vector.broadcast %254 : vector<16x1xf32> to vector<16x16xf32>
    %256 = arith.mulf %251, %255 : vector<16x16xf32>
    %257 = arith.truncf %256 : vector<16x16xf32> to vector<16x16xbf16>
    %cst_87 = arith.constant dense<0.000000e+00> : vector<16x8xf32>
    %258 = tpu.matmul %257, %240, %cst_87 {dimension_numbers = #tpu.dot_dimension_numbers<[1], [0], [0], [1], [0, 0, 1, 1], [], []>} : vector<16x16xbf16>, vector<16x8xbf16>, vector<16x8xf32> -> vector<16x8xf32>
    %259 = tpu.concatenate %186, %210, %234, %258 in 1 : vector<16x8xf32>, vector<16x8xf32>, vector<16x8xf32>, vector<16x8xf32> -> vector<16x32xf32>
    %c0_88 = arith.constant 0 : index
    %c320 = arith.constant 320 : index
    %260 = vector.load %arg2[%c0_88, %c320] : memref<32x512xbf16, #tpu.memory_space<vmem>>, vector<32x32xbf16>
    %261 = arith.truncf %259 : vector<16x32xf32> to vector<16x32xbf16>
    %cst_89 = arith.constant dense<0.000000e+00> : vector<16x32xf32>
    %262 = tpu.matmul %261, %260, %cst_89 {dimension_numbers = #tpu.dot_dimension_numbers<[1], [0], [0], [1], [0, 0, 1, 1], [], []>} : vector<16x32xbf16>, vector<32x32xbf16>, vector<16x32xf32> -> vector<16x32xf32>
    %263 = arith.addf %146, %262 : vector<16x32xf32>
    %c3_90 = arith.constant 3 : index
    %c0_91 = arith.constant 0 : index
    %264 = vector.load %arg3[%c3_90, %c0_91] : memref<5x32xf32, #tpu.memory_space<vmem>>, vector<1x32xf32>
    %265 = arith.mulf %263, %263 : vector<16x32xf32>
    %cst_92 = arith.constant dense<0.000000e+00> : vector<16xf32>
    %266 = vector.multi_reduction <add>, %265, %cst_92 [1] : vector<16x32xf32> to vector<16xf32>
    %267 = vector.shape_cast %266 : vector<16xf32> to vector<16x1xf32>
    %cst_93 = arith.constant 3.200000e+01 : f32
    %268 = vector.broadcast %cst_93 : f32 to vector<16x1xf32>
    %269 = arith.divf %267, %268 : vector<16x1xf32>
    %cst_94 = arith.constant 9.99999974E-6 : f32
    %270 = vector.broadcast %cst_94 : f32 to vector<16x1xf32>
    %271 = arith.addf %269, %270 : vector<16x1xf32>
    %272 = math.rsqrt %271 : vector<16x1xf32>
    %273 = vector.broadcast %272 : vector<16x1xf32> to vector<16x32xf32>
    %274 = arith.mulf %263, %273 : vector<16x32xf32>
    %275 = vector.broadcast %264 : vector<1x32xf32> to vector<16x32xf32>
    %276 = arith.mulf %274, %275 : vector<16x32xf32>
    %c0_95 = arith.constant 0 : index
    %c352 = arith.constant 352 : index
    %277 = vector.load %arg2[%c0_95, %c352] : memref<32x512xbf16, #tpu.memory_space<vmem>>, vector<32x64xbf16>
    %278 = arith.truncf %276 : vector<16x32xf32> to vector<16x32xbf16>
    %cst_96 = arith.constant dense<0.000000e+00> : vector<16x64xf32>
    %279 = tpu.matmul %278, %277, %cst_96 {dimension_numbers = #tpu.dot_dimension_numbers<[1], [0], [0], [1], [0, 0, 1, 1], [], []>} : vector<16x32xbf16>, vector<32x64xbf16>, vector<16x64xf32> -> vector<16x64xf32>
    %280 = vector.extract_strided_slice %279 {offsets = [0, 0], sizes = [16, 32], strides = [1, 1]} : vector<16x64xf32> to vector<16x32xf32>
    %281 = vector.extract_strided_slice %279 {offsets = [0, 32], sizes = [16, 32], strides = [1, 1]} : vector<16x64xf32> to vector<16x32xf32>
    %282 = arith.negf %280 : vector<16x32xf32>
    %283 = math.exp %282 : vector<16x32xf32>
    %cst_97 = arith.constant 1.000000e+00 : f32
    %284 = vector.broadcast %cst_97 : f32 to vector<16x32xf32>
    %285 = arith.addf %284, %283 : vector<16x32xf32>
    %286 = arith.divf %284, %285 : vector<16x32xf32>
    %287 = arith.mulf %280, %286 : vector<16x32xf32>
    %288 = arith.mulf %287, %281 : vector<16x32xf32>
    %c0_98 = arith.constant 0 : index
    %c416 = arith.constant 416 : index
    %289 = vector.load %arg2[%c0_98, %c416] : memref<32x512xbf16, #tpu.memory_space<vmem>>, vector<32x32xbf16>
    %290 = arith.truncf %288 : vector<16x32xf32> to vector<16x32xbf16>
    %cst_99 = arith.constant dense<0.000000e+00> : vector<16x32xf32>
    %291 = tpu.matmul %290, %289, %cst_99 {dimension_numbers = #tpu.dot_dimension_numbers<[1], [0], [0], [1], [0, 0, 1, 1], [], []>} : vector<16x32xbf16>, vector<32x32xbf16>, vector<16x32xf32> -> vector<16x32xf32>
    %292 = arith.addf %263, %291 : vector<16x32xf32>
    %c4 = arith.constant 4 : index
    %c0_100 = arith.constant 0 : index
    %293 = vector.load %arg3[%c4, %c0_100] : memref<5x32xf32, #tpu.memory_space<vmem>>, vector<1x32xf32>
    %294 = arith.mulf %292, %292 : vector<16x32xf32>
    %cst_101 = arith.constant dense<0.000000e+00> : vector<16xf32>
    %295 = vector.multi_reduction <add>, %294, %cst_101 [1] : vector<16x32xf32> to vector<16xf32>
    %296 = vector.shape_cast %295 : vector<16xf32> to vector<16x1xf32>
    %cst_102 = arith.constant 3.200000e+01 : f32
    %297 = vector.broadcast %cst_102 : f32 to vector<16x1xf32>
    %298 = arith.divf %296, %297 : vector<16x1xf32>
    %cst_103 = arith.constant 9.99999974E-6 : f32
    %299 = vector.broadcast %cst_103 : f32 to vector<16x1xf32>
    %300 = arith.addf %298, %299 : vector<16x1xf32>
    %301 = math.rsqrt %300 : vector<16x1xf32>
    %302 = vector.broadcast %301 : vector<16x1xf32> to vector<16x32xf32>
    %303 = arith.mulf %292, %302 : vector<16x32xf32>
    %304 = vector.broadcast %293 : vector<1x32xf32> to vector<16x32xf32>
    %305 = arith.mulf %303, %304 : vector<16x32xf32>
    %c0_104 = arith.constant 0 : index
    %c448 = arith.constant 448 : index
    %306 = vector.load %arg2[%c0_104, %c448] : memref<32x512xbf16, #tpu.memory_space<vmem>>, vector<32x64xbf16>
    %307 = arith.truncf %305 : vector<16x32xf32> to vector<16x32xbf16>
    %cst_105 = arith.constant dense<0.000000e+00> : vector<16x64xf32>
    %308 = tpu.matmul %307, %306, %cst_105 {dimension_numbers = #tpu.dot_dimension_numbers<[1], [0], [0], [1], [0, 0, 1, 1], [], []>} : vector<16x32xbf16>, vector<32x64xbf16>, vector<16x64xf32> -> vector<16x64xf32>
    %cst_106 = arith.constant dense<0xFF800000> : vector<16xf32>
    %309 = vector.multi_reduction <maximumf>, %308, %cst_106 [1] : vector<16x64xf32> to vector<16xf32>
    %310 = vector.shape_cast %309 : vector<16xf32> to vector<16x1xf32>
    %311 = tpu.iota {dimensions = array<i32: 1>} : vector<16x64xi32>
    %312 = arith.sitofp %311 : vector<16x64xi32> to vector<16x64xf32>
    %313 = vector.broadcast %310 : vector<16x1xf32> to vector<16x64xf32>
    %314 = arith.cmpf oeq, %308, %313 : vector<16x64xf32>
    %cst_107 = arith.constant 6.400000e+01 : f32
    %315 = vector.broadcast %cst_107 : f32 to vector<16x64xf32>
    %316 = arith.select %314, %312, %315 : vector<16x64xi1>, vector<16x64xf32>
    %cst_108 = arith.constant dense<0x7F800000> : vector<16xf32>
    %317 = vector.multi_reduction <minimumf>, %316, %cst_108 [1] : vector<16x64xf32> to vector<16xf32>
    %318 = vector.shape_cast %317 : vector<16xf32> to vector<16x1xf32>
    %319 = arith.fptosi %318 : vector<16x1xf32> to vector<16x1xi32>
    %c0_109 = arith.constant 0 : index
    %c0_110 = arith.constant 0 : index
    %320 = vector.load %arg4[%c0_109, %c0_110] : memref<16x1xi32, #tpu.memory_space<vmem>>, vector<16x1xi32>
    tpu.vector_store %arg4[%c0_109, %c0_110], %319 {strides = array<i32>} : memref<16x1xi32, #tpu.memory_space<vmem>>, vector<16x1xi32>,
    return
  }
}

</mosaic_0001>

<bundles_post_ra>
// kernel: squeeze.3
= control target key start
LH: loop header
LB: loop body
LE: loop exit
PB: predicated region body
PF: predicated region fallthrough
CT: control target
= control target key end

     0   :  { %s85_s0 = inlined_call_operand.vmem [shape: s32[16], index: 0, kind: input, shape index: {}]   ;;  %s86_s1 = inlined_call_operand.hbm [shape: s32[2,8], index: 1, kind: output, shape index: {}]  }
   0x1   :  { %v5_v0 = vld [vmem:[%s85_s0] sm:$0x1] }
   0x2   :  { %2 = vsyncpa [#allocation1], 0  ;;  %6 = vst [vmem:[#allocation3] sm:$0x1] %v5_v0  ;;  %vm8_vm0 = vcmask 64512   ;;  %s58_s0 = smov 120  }
   0x3   :  { %s59_s8 = smov [#allocation0]  }
   0x4   :  { %s26_s9 = sshll.u32 %s59_s8, 4  ;;  %s27_s9 = int_to_ptr.vmem [resolvable:$true] %s26_s9 }
   0x5   :  { %s34_s10 = scalar_lea.vmem %s27_s9, 32  ;;  %p39_p1 = scmp.lt.s32.totalorder %s27_s9, %s27_s9 }
   0x6   :  { %p35_p0 = scmp.ne.s32.totalorder %s27_s9, %s34_s10  ;;  %p40_p2 = scmp.lt.s32.totalorder %s34_s10, %s34_s10 }
   0x8   :  { %p41_p3 = por %p40_p2, %p39_p1 }
   0x9   :  { %v10_v1 = vld [vmem:[#allocation3] sm:$0x1]  }
   0xa   :  { %v7_v2 = vld [vmem:[#allocation3] sm:$0x1]   ;;  %11 = vrot.lane.b32.xlu0 %v10_v1, %s58_s0  ;;  %p42_p4 = pnand %p41_p3, %p35_p0 }
   0xb   :  { %9 = vst.msk [vmem:[#allocation2] sm:$0x1] %vm8_vm0, %v7_v2  }
  0x7c   :  { %v12_v3 = vpop.permute.xlu0 %11  }
  0x7d   :  { %15 = vst.msk [vmem:[#allocation2 + $0x1] sm:$0x1] %vm8_vm0, %v12_v3  }
  0x84   :  { %v19_v4 = vld [vmem:[#allocation2] sm:$0x3] }
  0x85   :  { %21 = vst [vmem:[#allocation0] sm:$0x3] %v19_v4 }
  0x86   :  { %45 = shalt.err (!%p42_p4)
}
  0x87   :  { %s46_s13 = scalar_lea.hbm %s86_s1, 32 }
  0x88   :  { %p47_p5 = scmp.ne.s32.totalorder %s86_s1, %s46_s13  ;;  %p50_p6 = scmp.lt.u32.totalorder %s46_s13, %s86_s1 }
  0x8a   :  { %p52_p7 = pnand %p50_p6, %p47_p5 }
  0x8c   :  { %55 = shalt.err (!%p52_p7)
}
  0x8d   :  { %29 = dma.vmem_to_hbm [thread:$0]  %s27_s9, 32, %s86_s1, [#allocation1]  }
  0x8e   :  { %56 = dma.done.wait [#allocation1], 32  }
  0x8f   :  { %57 = vsyncadd [#allocation1], 4294967264 }
  0x90   :  { %31 = vsyncpa [#allocation1], 1 }

// kernel: bat_transformer_forward.1
= control target key start
LH: loop header
LB: loop body
LE: loop exit
PB: predicated region body
PF: predicated region fallthrough
CT: control target
= control target key end

     0   :  { %vm23_vm0 = vcmask 261120   ;;  %v2342_v6 = vmov 0.0   ;;  %vm2343_vm1 = vmmov 0   ;;  %s2344_s24 = smov 120   ;;  %s2345_s25 = smov 96   ;;  %vm110_vm2 = vcmask 64512   ;;  %s2830_s0 = inlined_call_operand.vmem [shape: f32[16,32], index: 0, kind: input, shape index: {}]   ;;  %s2831_s2 = inlined_call_operand.vmem [shape: bf16[32,512], index: 2, kind: input, shape index: {}]   ;;  %s2832_s3 = inlined_call_operand.vmem [shape: f32[5,32], index: 3, kind: input, shape index: {}]   ;;  %s2833_s1 = inlined_call_operand.vmem [shape: f32[4,16,16], index: 1, kind: input, shape index: {}]   ;;  %s2834_s4 = inlined_call_operand.vmem [shape: s32[16,1], index: 4, kind: output, shape index: {}]  }
   0x1   :  { %v2387_v0 = vld [vmem:[%s2830_s0] sm:$0xff]  ;;  %v2392_v1 = vld [vmem:[%s2830_s0 + $0x8] sm:$0xff]  ;;  %2001 = vmatprep.subr.bf16.mxu0 %v2342_v6  ;;  %2005 = vmatprep.mubr.msk.bf16.mxu0 %vm2343_vm1, %v2342_v6  ;;  %s2346_s26 = smov 88   ;;  %s2347_s27 = smov 80   ;;  %vm164_vm3 = vcmask 130048   ;;  %v2476_v52 = vld [vmem:[%s2833_s1 + $0x10] sm:$0xff] }
   0x2   :  { %v21_v2 = vmul.f32 %v2387_v0, %v2387_v0  ;;  %v22_v3 = vmul.f32 %v2392_v1, %v2392_v1  ;;  %v2220_v7 = vld [vmem:[%s2831_s2] ss:$16 sps:$4 sm:$0xff]   ;;  %2009 = vmatprep.subr.bf16.mxu1 %v2342_v6  ;;  %2011 = vmatprep.mubr.msk.bf16.mxu1 %vm2343_vm1, %v2342_v6  ;;  %s2348_s28 = smov 112   ;;  %s2349_s29 = smov 72   ;;  %v2467_v44 = vld [vmem:[%s2833_s1 + $0x8] sm:$0xff]  ;;  %v2481_v56 = vld [vmem:[%s2833_s1 + $0x18] sm:$0xff] }
   0x3   :  { %2002 = vmatpush3.bf16.msra.mxu0 %v2220_v7  ;;  %v2221_v8 = vld [vmem:[%s2831_s2 + $0x20] ss:$16 sps:$4 sm:$0xff]   ;;  %s2350_s30 = smov 104   ;;  %v2495_v7 = vld [vmem:[%s2833_s1 + $0x28] sm:$0xff]  ;;  %s2351_s0 = smov 64   ;;  %vm647_vm4 = vcmask 195584  }
   0x4   :  { %v24_v4 = vsel %vm23_vm0, %v21_v2, 0.0  ;;  %v27_v5 = vsel %vm23_vm0, %v22_v3, 0.0  ;;  %2003 = vmatprep.subr.bf16.mxu0 %v2342_v6  ;;  %v1878_v18 = vld [vmem:[%s2832_s3] ss:$0 sm:$0xff]  ;;  %s2353_s21 = smov 40   ;;  %s2354_s22 = smov 56  }
   0x5   :  { %25 = vadd.xlane.f32.xlu0 %v24_v4  ;;  %v2462_v40 = vld [vmem:[%s2833_s1] sm:$0xff]  ;;  %s2355_s6 = smov 32   ;;  %s2356_s7 = smov 8   ;;  %vm1849_vm5 = vcmask 523264   ;;  %vm1871_vm8 = vcmask 7168  }
   0x6   :  { %v2490_v2 = vld [vmem:[%s2833_s1 + $0x20] sm:$0xff]  ;;  %s2357_s8 = smov 16   ;;  %s2358_s11 = smov 24  }
   0x7   :  { %2004 = vmatpush3.bf16.msra.mxu0 %v2221_v8 }
   0x8   :  { %2015 = vmatprep.subr.bf16.mxu0 %v2342_v6 }
   0x9   :  { %28 = vadd.xlane.f32.xlu0 %v27_v5 }
  0x92   :  { %v26_v9 = vpop.xlane.xlu0 %25 }
  0x93   :  { %v31_v10 = vmul.f32 0.03125, %v26_v9 }
  0x95   :  { %v33_v11 = vadd.f32 1e-05, %v31_v10 }
  0x96   :  { %v29_v12 = vpop.xlane.xlu0 %28 }
  0x97   :  { %2242 = vrsqrt.f32 %v33_v11  ;;  %v32_v13 = vmul.f32 0.03125, %v29_v12 }
  0x99   :  { %v34_v14 = vadd.f32 1e-05, %v32_v13 }
  0x9b   :  { %2244 = vrsqrt.f32 %v34_v14 }
  0xa1   :  { %v2243_v15 = vpop.eup %2242 }
  0xa2   :  { %v37_v16 = vmul.f32 %v2243_v15, %v2387_v0  ;;  %v2504_v15 = vld [vmem:[%s2833_s1 + $0x30] sm:$0xff] }
  0xa4   :  { %v43_v20 = vmul.f32 %v1878_v18, %v37_v16 }
  0xa5   :  { %v2245_v17 = vpop.eup %2244 }
  0xa6   :  { %v38_v19 = vmul.f32 %v2245_v17, %v2392_v1 }
  0xa8   :  { %v44_v21 = vmul.f32 %v1878_v18, %v38_v19  ;;  %v2509_v19 = vld [vmem:[%s2833_s1 + $0x38] sm:$0xff]  ;;  %s2352_s1 = smov 48  }
  0xaa   :  { %v49_v22 = vpack.c.bf16 %v44_v21, %v43_v20 }
  0xac   :  { %2006 = vmatmul.mubr.msk.bf16.vlgmr.msra.gmra.mrb[0].mxu0 %vm23_vm0, %v49_v22 }
  0xad   :  { %2017 = vmatprep.mubr.msk.bf16.mxu0 %vm2343_vm1, %v2342_v6 }
 0x17f   :  { %v99_v23 = vpop.f32.mrb[0].mxu0 }
 0x180   :  { %v2007_v24 = vpop.f32.mrb[1].mxu0 }
 0x181   :  { %v102_v25 = vpop.f32.mrb[2].mxu0 }
 0x182   :  { %v2422_v26 = vpack.c.bf16 %v102_v25, %v99_v23  ;;  %v2008_v27 = vpop.f32.mrb[3].mxu0 }
 0x184   :  { %235 = vrot.lane.b32.xlu0 %v2422_v26, %s2344_s24  ;;  %108 = vrot.lane.b32.xlu1 %v2422_v26, %s2345_s25 }
 0x188   :  { %237 = vrot.lane.b32.xlu1 %v2422_v26, %s2346_s26 }
 0x18c   :  { %365 = vrot.lane.b32.xlu1 %v2422_v26, %s2347_s27 }
 0x190   :  { %363 = vrot.lane.b32.xlu1 %v2422_v26, %s2348_s28 }
 0x194   :  { %493 = vrot.lane.b32.xlu1 %v2422_v26, %s2349_s29 }
 0x198   :  { %491 = vrot.lane.b32.xlu1 %v2422_v26, %s2350_s30 }
 0x1f6   :  { %v109_v28 = vpop.permute.xlu1 %108  ;;  %v236_v33 = vpop.permute.xlu0 %235 }
 0x1f7   :  { %v115_v29 = vsel %vm110_vm2, %v109_v28, 0 }
 0x1f8   :  { %2010 = vmatpush3.bf16.xpose.msra.mxu1 %v115_v29 }
 0x1f9   :  { %2021 = vmatprep.subr.bf16.mxu1 %v2342_v6 }
 0x1fa   :  { %v238_v30 = vpop.permute.xlu1 %237 }
 0x1fb   :  { %v243_v31 = vsel %vm110_vm2, %v238_v30, 0 }
 0x1fe   :  { %v366_v32 = vpop.permute.xlu1 %365 }
 0x1ff   :  { %2012 = vmatmul.mubr.msk.bf16.vlgmr.msra.gmra.mrb[0].mxu1 %vm110_vm2, %v2422_v26  ;;  %v371_v35 = vsel %vm110_vm2, %v366_v32, 0 }
 0x200   :  { %2022 = vmatpush3.bf16.xpose.msra.mxu1 %v243_v31  ;;  %2023 = vmatprep.mubr.msk.bf16.mxu1 %vm2343_vm1, %v2342_v6 }
 0x201   :  { %2033 = vmatprep.subr.bf16.mxu1 %v2342_v6 }
 0x202   :  { %v364_v34 = vpop.permute.xlu1 %363 }
 0x206   :  { %v494_v36 = vpop.permute.xlu1 %493 }
 0x207   :  { %2024 = vmatmul.mubr.msk.bf16.vlgmr.msra.gmra.mrb[4].mxu1 %vm110_vm2, %v236_v33  ;;  %v499_v37 = vsel %vm110_vm2, %v494_v36, 0 }
 0x208   :  { %2034 = vmatpush3.bf16.xpose.msra.mxu1 %v371_v35  ;;  %2035 = vmatprep.mubr.msk.bf16.mxu1 %vm2343_vm1, %v2342_v6 }
 0x209   :  { %2045 = vmatprep.subr.bf16.mxu1 %v2342_v6 }
 0x20a   :  { %v492_v38 = vpop.permute.xlu1 %491 }
 0x20f   :  { %2036 = vmatmul.mubr.msk.bf16.vlgmr.msra.gmra.mrb[8].mxu1 %vm110_vm2, %v364_v34 }
 0x210   :  { %2046 = vmatpush3.bf16.xpose.msra.mxu1 %v499_v37  ;;  %2047 = vmatprep.mubr.msk.bf16.mxu1 %vm2343_vm1, %v2342_v6 }
 0x211   :  { %2057 = vmatprep.subr.bf16.mxu1 %v2342_v6 }
 0x217   :  { %2048 = vmatmul.mubr.msk.bf16.vlgmr.msra.gmra.mrb[12].mxu1 %vm110_vm2, %v492_v38 }
 0x218   :  { %2061 = vmatprep.mubr.msk.bf16.mxu1 %vm2343_vm1, %v2342_v6 }
 0x2d2   :  { %v151_v39 = vpop.f32.mrb[0].mxu1 }
 0x2d3   :  { %v158_v41 = vmul.f32 0.35355338, %v151_v39  ;;  %v2013_v42 = vpop.f32.mrb[1].mxu1 }
 0x2d4   :  { %v154_v43 = vpop.f32.mrb[2].mxu1 }
 0x2d5   :  { %v159_v45 = vmul.f32 0.35355338, %v154_v43  ;;  %v2014_v46 = vpop.f32.mrb[3].mxu1  ;;  %v162_v47 = vadd.f32 %v2462_v40, %v158_v41 }
 0x2d7   :  { %v165_v48 = vsel %vm164_vm3, %v162_v47, -inf  ;;  %v163_v49 = vadd.f32 %v2467_v44, %v159_v45 }
 0x2d8   :  { %166 = vmax.xlane.f32.xlu1 %v165_v48 }
 0x2d9   :  { %v168_v50 = vsel %vm164_vm3, %v163_v49, -inf }
 0x2da   :  { %169 = vmax.xlane.f32.xlu0 %v168_v50  ;;  %v279_v51 = vpop.f32.mrb[4].mxu1 }
 0x2db   :  { %v286_v53 = vmul.f32 0.35355338, %v279_v51  ;;  %v2025_v54 = vpop.f32.mrb[5].mxu1 }
 0x2dc   :  { %v282_v55 = vpop.f32.mrb[6].mxu1 }
 0x2dd   :  { %v287_v57 = vmul.f32 0.35355338, %v282_v55  ;;  %v2026_v58 = vpop.f32.mrb[7].mxu1  ;;  %v291_v59 = vadd.f32 %v2476_v52, %v286_v53 }
 0x2df   :  { %v293_v60 = vsel %vm164_vm3, %v291_v59, -inf  ;;  %v292_v61 = vadd.f32 %v2481_v56, %v287_v57 }
 0x2e0   :  { %294 = vmax.xlane.f32.xlu1 %v293_v60 }
 0x2e1   :  { %v296_v62 = vsel %vm164_vm3, %v292_v61, -inf }
 0x2e2   :  { %297 = vmax.xlane.f32.xlu0 %v296_v62  ;;  %v407_v63 = vpop.f32.mrb[8].mxu1 }
 0x2e3   :  { %v414_v3 = vmul.f32 0.35355338, %v407_v63  ;;  %v2037_v4 = vpop.f32.mrb[9].mxu1 }
 0x2e4   :  { %v410_v5 = vpop.f32.mrb[10].mxu1 }
 0x2e5   :  { %v415_v8 = vmul.f32 0.35355338, %v410_v5  ;;  %v2038_v9 = vpop.f32.mrb[11].mxu1  ;;  %v419_v10 = vadd.f32 %v2490_v2, %v414_v3 }
 0x2e7   :  { %v421_v11 = vsel %vm164_vm3, %v419_v10, -inf  ;;  %v420_v12 = vadd.f32 %v2495_v7, %v415_v8 }
 0x2e8   :  { %422 = vmax.xlane.f32.xlu1 %v421_v11 }
 0x2e9   :  { %v424_v13 = vsel %vm164_vm3, %v420_v12, -inf }
 0x2ea   :  { %425 = vmax.xlane.f32.xlu0 %v424_v13  ;;  %v535_v14 = vpop.f32.mrb[12].mxu1 }
 0x2eb   :  { %v542_v16 = vmul.f32 0.35355338, %v535_v14  ;;  %v2049_v17 = vpop.f32.mrb[13].mxu1 }
 0x2ec   :  { %v538_v18 = vpop.f32.mrb[14].mxu1 }
 0x2ed   :  { %v543_v20 = vmul.f32 0.35355338, %v538_v18  ;;  %v2050_v21 = vpop.f32.mrb[15].mxu1  ;;  %v547_v22 = vadd.f32 %v2504_v15, %v542_v16 }
 0x2ef   :  { %v549_v23 = vsel %vm164_vm3, %v547_v22, -inf  ;;  %v548_v24 = vadd.f32 %v2509_v19, %v543_v20 }
 0x2f0   :  { %550 = vmax.xlane.f32.xlu1 %v549_v23 }
 0x2f1   :  { %v552_v25 = vsel %vm164_vm3, %v548_v24, -inf }
 0x2f2   :  { %553 = vmax.xlane.f32.xlu0 %v552_v25 }
 0x301   :  { %188 = vrot.lane.b32.xlu1 %v2422_v26, %s2351_s0 }
 0x365   :  { %v167_v27 = vpop.xlane.xlu1 %166 }
 0x366   :  { %v171_v28 = vsub.f32 %v162_v47, %v167_v27 }
 0x367   :  { %v170_v29 = vpop.xlane.xlu0 %169 }
 0x368   :  { %v173_v30 = vmul.f32 1.442695, %v171_v28  ;;  %v172_v31 = vsub.f32 %v163_v49, %v170_v29 }
 0x36a   :  { %2246 = vpow2.f32 %v173_v30  ;;  %v175_v32 = vmul.f32 1.442695, %v172_v31 }
 0x36c   :  { %2248 = vpow2.f32 %v175_v32 }
 0x36d   :  { %v295_v33 = vpop.xlane.xlu1 %294 }
 0x36e   :  { %v299_v34 = vsub.f32 %v291_v59, %v295_v33 }
 0x36f   :  { %v298_v35 = vpop.xlane.xlu0 %297 }
 0x370   :  { %v301_v36 = vmul.f32 1.442695, %v299_v34  ;;  %v300_v37 = vsub.f32 %v292_v61, %v298_v35 }
 0x372   :  { %2250 = vpow2.f32 %v301_v36  ;;  %v303_v38 = vmul.f32 1.442695, %v300_v37 }
 0x374   :  { %v2247_v39 = vpop.eup %2246  ;;  %2252 = vpow2.f32 %v303_v38 }
 0x375   :  { %v423_v41 = vpop.xlane.xlu1 %422  ;;  %v177_v42 = vsel %vm164_vm3, %v2247_v39, 0.0 }
 0x376   :  { %v2249_v43 = vpop.eup %2248  ;;  %v427_v45 = vsub.f32 %v419_v10, %v423_v41  ;;  %178 = vadd.xlane.f32.xlu1 %v177_v42 }
 0x377   :  { %v426_v46 = vpop.xlane.xlu0 %425  ;;  %v180_v47 = vsel %vm164_vm3, %v2249_v43, 0.0 }
 0x378   :  { %v429_v48 = vmul.f32 1.442695, %v427_v45  ;;  %v428_v49 = vsub.f32 %v420_v12, %v426_v46  ;;  %181 = vadd.xlane.f32.xlu0 %v180_v47 }
 0x37a   :  { %2254 = vpow2.f32 %v429_v48  ;;  %v431_v50 = vmul.f32 1.442695, %v428_v49  ;;  %v2222_v48 = vld [vmem:[%s2831_s2] ss:$16 sps:$4 sm:$0xff]  }
 0x37c   :  { %v2251_v51 = vpop.eup %2250  ;;  %2256 = vpow2.f32 %v431_v50 }
 0x37d   :  { %v551_v53 = vpop.xlane.xlu1 %550  ;;  %v305_v54 = vsel %vm164_vm3, %v2251_v51, 0.0 }
 0x37e   :  { %v2253_v55 = vpop.eup %2252  ;;  %v555_v57 = vsub.f32 %v547_v22, %v551_v53  ;;  %306 = vadd.xlane.f32.xlu1 %v305_v54 }
 0x37f   :  { %v554_v58 = vpop.xlane.xlu0 %553  ;;  %v308_v59 = vsel %vm164_vm3, %v2253_v55, 0.0 }
 0x380   :  { %v557_v60 = vmul.f32 1.442695, %v555_v57  ;;  %v556_v61 = vsub.f32 %v548_v24, %v554_v58  ;;  %309 = vadd.xlane.f32.xlu0 %v308_v59 }
 0x381   :  { %v189_v62 = vpop.permute.xlu1 %188 }
 0x382   :  { %2258 = vpow2.f32 %v557_v60  ;;  %v559_v63 = vmul.f32 1.442695, %v556_v61  ;;  %2016 = vmatpush3.bf16.msra.mxu0 %v189_v62 }
 0x383   :  { %2027 = vmatprep.subr.bf16.mxu0 %v2342_v6 }
 0x384   :  { %v2255_v3 = vpop.eup %2254  ;;  %2260 = vpow2.f32 %v559_v63 }
 0x385   :  { %v433_v4 = vsel %vm164_vm3, %v2255_v3, 0.0 }
 0x386   :  { %v2257_v5 = vpop.eup %2256  ;;  %434 = vadd.xlane.f32.xlu1 %v433_v4 }
 0x387   :  { %v436_v8 = vsel %vm164_vm3, %v2257_v5, 0.0 }
 0x388   :  { %437 = vadd.xlane.f32.xlu0 %v436_v8 }
 0x38c   :  { %v2259_v9 = vpop.eup %2258 }
 0x38d   :  { %v561_v10 = vsel %vm164_vm3, %v2259_v9, 0.0 }
 0x38e   :  { %v2261_v11 = vpop.eup %2260  ;;  %562 = vadd.xlane.f32.xlu1 %v561_v10 }
 0x38f   :  { %v564_v12 = vsel %vm164_vm3, %v2261_v11, 0.0 }
 0x390   :  { %565 = vadd.xlane.f32.xlu0 %v564_v12 }
 0x39f   :  { %444 = vrot.lane.b32.xlu1 %v2422_v26, %s2352_s1 }
 0x3a3   :  { %572 = vrot.lane.b32.xlu1 %v2422_v26, %s2353_s21 }
 0x3a6   :  { %316 = vrot.lane.b32.xlu0 %v2422_v26, %s2354_s22 }
 0x3aa   :  { %665 = vrot.lane.b32.xlu0 %v2222_v48, %s2355_s6 }
 0x403   :  { %v179_v13 = vpop.xlane.xlu1 %178 }
 0x404   :  { %2262 = vrcp.f32 %v179_v13 }
 0x405   :  { %v182_v14 = vpop.xlane.xlu0 %181 }
 0x406   :  { %2264 = vrcp.f32 %v182_v14 }
 0x40b   :  { %v307_v22 = vpop.xlane.xlu1 %306 }
 0x40d   :  { %v310_v17 = vpop.xlane.xlu0 %309 }
 0x40e   :  { %v2263_v16 = vpop.eup %2262  ;;  %2266 = vrcp.f32 %v310_v17 }
 0x40f   :  { %v185_v20 = vmul.f32 %v2263_v16, %v2247_v39  ;;  %2268 = vrcp.f32 %v307_v22 }
 0x410   :  { %v2265_v18 = vpop.eup %2264 }
 0x411   :  { %v186_v21 = vmul.f32 %v2265_v18, %v2249_v43 }
 0x413   :  { %v187_v23 = vpack.c.bf16 %v186_v21, %v185_v20  ;;  %v435_v26 = vpop.xlane.xlu1 %434 }
 0x415   :  { %2018 = vmatmul.mubr.msk.bf16.vlgmr.msra.gmra.mrb[4].mxu0 %vm164_vm3, %v187_v23  ;;  %v438_v24 = vpop.xlane.xlu0 %437 }
 0x416   :  { %2029 = vmatprep.mubr.msk.bf16.mxu0 %vm2343_vm1, %v2342_v6  ;;  %2270 = vrcp.f32 %v438_v24 }
 0x417   :  { %2272 = vrcp.f32 %v435_v26 }
 0x418   :  { %v2267_v25 = vpop.eup %2266 }
 0x419   :  { %v2269_v28 = vpop.eup %2268  ;;  %v314_v29 = vmul.f32 %v2267_v25, %v2253_v55 }
 0x41a   :  { %v313_v31 = vmul.f32 %v2269_v28, %v2251_v51 }
 0x41b   :  { %v563_v30 = vpop.xlane.xlu1 %562 }
 0x41c   :  { %v315_v33 = vpack.c.bf16 %v314_v29, %v313_v31 }
 0x41d   :  { %v566_v27 = vpop.xlane.xlu0 %565 }
 0x41e   :  { %2274 = vrcp.f32 %v566_v27 }
 0x41f   :  { %2276 = vrcp.f32 %v563_v30  ;;  %v445_v35 = vpop.permute.xlu1 %444 }
 0x420   :  { %v2271_v34 = vpop.eup %2270 }
 0x421   :  { %v317_v32 = vpop.permute.xlu0 %316  ;;  %v2273_v36 = vpop.eup %2272  ;;  %v442_v37 = vmul.f32 %v2271_v34, %v2257_v5  ;;  %v2223_v5 = vld [vmem:[%s2831_s2 + $0x20] ss:$16 sps:$4 sm:$0xff]  }
 0x422   :  { %2028 = vmatpush3.bf16.msra.mxu0 %v317_v32  ;;  %v441_v38 = vmul.f32 %v2273_v36, %v2255_v3 }
 0x423   :  { %2039 = vmatprep.subr.bf16.mxu0 %v2342_v6  ;;  %v573_v42 = vpop.permute.xlu1 %572 }
 0x424   :  { %v443_v39 = vpack.c.bf16 %v442_v37, %v441_v38 }
 0x425   :  { %2030 = vmatmul.mubr.msk.bf16.vlgmr.msra.gmra.mrb[8].mxu0 %vm164_vm3, %v315_v33  ;;  %v666_v54 = vpop.permute.xlu0 %665 }
 0x426   :  { %2040 = vmatpush3.bf16.msra.mxu0 %v445_v35  ;;  %2041 = vmatprep.mubr.msk.bf16.mxu0 %vm2343_vm1, %v2342_v6 }
 0x427   :  { %2051 = vmatprep.subr.bf16.mxu0 %v2342_v6  ;;  %2058 = vmatpush3.bf16.msra.mxu1 %v666_v54  ;;  %v1899_v54 = vld [vmem:[%s2832_s3 + $0x1] ss:$0 sm:$0xff] }
 0x428   :  { %v2275_v41 = vpop.eup %2274  ;;  %2059 = vmatprep.subr.bf16.mxu1 %v2342_v6 }
 0x429   :  { %v2277_v43 = vpop.eup %2276  ;;  %v570_v45 = vmul.f32 %v2275_v41, %v2261_v11 }
 0x42a   :  { %v569_v46 = vmul.f32 %v2277_v43, %v2259_v9 }
 0x42c   :  { %v571_v47 = vpack.c.bf16 %v570_v45, %v569_v46 }
 0x42d   :  { %2042 = vmatmul.mubr.msk.bf16.vlgmr.msra.gmra.mrb[12].mxu0 %vm164_vm3, %v443_v39 }
 0x42e   :  { %2052 = vmatpush3.bf16.msra.mxu0 %v573_v42  ;;  %2053 = vmatprep.mubr.msk.bf16.mxu0 %vm2343_vm1, %v2342_v6 }
 0x42f   :  { %2065 = vmatprep.subr.bf16.mxu0 %v2342_v6 }
 0x435   :  { %2054 = vmatmul.mubr.msk.bf16.vlgmr.msra.gmra.mrb[16].mxu0 %vm164_vm3, %v571_v47 }
 0x436   :  { %2069 = vmatprep.mubr.msk.bf16.mxu0 %vm2343_vm1, %v2342_v6 }
 0x4e8   :  { %v228_v49 = vpop.f32.mrb[4].mxu0 }
 0x4e9   :  { %v2019_v50 = vpop.f32.mrb[5].mxu0 }
 0x4ea   :  { %v231_v51 = vpop.f32.mrb[6].mxu0 }
 0x4eb   :  { %v2020_v53 = vpop.f32.mrb[7].mxu0 }
 0x4f8   :  { %v356_v55 = vpop.f32.mrb[8].mxu0 }
 0x4f9   :  { %v2031_v57 = vpop.f32.mrb[9].mxu0 }
 0x4fa   :  { %v359_v58 = vpop.f32.mrb[10].mxu0 }
 0x4fb   :  { %v2190_v59 = vpack.i.bf16 %v359_v58, %v356_v55  ;;  %v2032_v60 = vpop.f32.mrb[11].mxu0 }
 0x4fd   :  { %2191 = vrot.lane.b32.xlu1 %v2190_v59, %s2356_s7 }
 0x500   :  { %v484_v61 = vpop.f32.mrb[12].mxu0 }
 0x501   :  { %v2043_v62 = vpop.f32.mrb[13].mxu0 }
 0x502   :  { %v487_v63 = vpop.f32.mrb[14].mxu0  ;;  %v2228_v62 = vld [vmem:[%s2831_s2 + $0x4] ss:$16 sps:$4 sm:$0xff]  }
 0x503   :  { %v2195_v3 = vpack.i.bf16 %v487_v63, %v484_v61  ;;  %v2044_v4 = vpop.f32.mrb[15].mxu0 }
 0x505   :  { %2196 = vrot.lane.b32.xlu0 %v2195_v3, %s2357_s8 }
 0x508   :  { %v612_v8 = vpop.f32.mrb[16].mxu0 }
 0x509   :  { %v2055_v9 = vpop.f32.mrb[17].mxu0  ;;  %667 = vrot.lane.b32.xlu0 %v2223_v5, %s2355_s6 }
 0x50a   :  { %v615_v10 = vpop.f32.mrb[18].mxu0 }
 0x50b   :  { %v2200_v11 = vpack.i.bf16 %v615_v10, %v612_v8  ;;  %v2056_v12 = vpop.f32.mrb[19].mxu0  ;;  %v2226_v8 = vld [vmem:[%s2831_s2 + $0x8] ss:$16 sps:$4 sm:$0xff]  }
 0x50d   :  { %2201 = vrot.lane.b32.xlu1 %v2200_v11, %s2358_s11 }
 0x56f   :  { %v2192_v14 = vpop.permute.xlu1 %2191 }
 0x570   :  { %v2194_v17 = vunpack.i.h.bf16 %v2192_v14  ;;  %v2193_v18 = vunpack.i.l.bf16 %v2192_v14 }
 0x572   :  { %v644_v23 = vsel %vm110_vm2, %v231_v51, %v2194_v17  ;;  %v643_v24 = vsel %vm110_vm2, %v228_v49, %v2193_v18 }
 0x577   :  { %v2197_v13 = vpop.permute.xlu0 %2196 }
 0x578   :  { %v2199_v20 = vunpack.i.h.bf16 %v2197_v13  ;;  %v2198_v21 = vunpack.i.l.bf16 %v2197_v13 }
 0x57a   :  { %v646_v27 = vsel %vm164_vm3, %v644_v23, %v2199_v20  ;;  %v645_v28 = vsel %vm164_vm3, %v643_v24, %v2198_v21 }
 0x57b   :  { %v668_v16 = vpop.permute.xlu0 %667 }
 0x57c   :  { %2060 = vmatpush3.bf16.msra.mxu1 %v668_v16 }
 0x57d   :  { %2073 = vmatprep.subr.bf16.mxu1 %v2342_v6 }
 0x57f   :  { %v2202_v22 = vpop.permute.xlu1 %2201 }
 0x580   :  { %v2204_v26 = vunpack.i.h.bf16 %v2202_v22  ;;  %v2203_v25 = vunpack.i.l.bf16 %v2202_v22 }
 0x582   :  { %v649_v29 = vsel %vm647_vm4, %v646_v27, %v2204_v26  ;;  %v648_v30 = vsel %vm647_vm4, %v645_v28, %v2203_v25 }
 0x583   :  { %v654_v31 = vpack.c.bf16 %v649_v29, %v648_v30 }
 0x585   :  { %2062 = vmatmul.mubr.msk.bf16.vlgmr.msra.gmra.mrb[16].mxu1 %vm23_vm0, %v654_v31 }
 0x586   :  { %2077 = vmatprep.mubr.msk.bf16.mxu1 %vm2343_vm1, %v2342_v6 }
 0x658   :  { %v708_v32 = vpop.f32.mrb[16].mxu1 }
 0x659   :  { %v2570_v33 = vadd.f32 %v708_v32, %v2387_v0  ;;  %v2063_v34 = vpop.f32.mrb[17].mxu1  ;;  %v2224_v0 = vld [vmem:[%s2831_s2 + $0x4] ss:$16 sps:$4 sm:$0xff]  }
 0x65a   :  { %v711_v35 = vpop.f32.mrb[18].mxu1  ;;  %2066 = vmatpush3.bf16.msra.mxu0 %v2224_v0 }
 0x65b   :  { %v2573_v36 = vadd.f32 %v711_v35, %v2392_v1  ;;  %v2064_v37 = vpop.f32.mrb[19].mxu1  ;;  %v718_v38 = vmul.f32 %v2570_v33, %v2570_v33  ;;  %v2225_v1 = vld [vmem:[%s2831_s2 + $0x24] ss:$16 sps:$4 sm:$0xff]   ;;  %2067 = vmatprep.subr.bf16.mxu0 %v2342_v6 }
 0x65d   :  { %v720_v39 = vsel %vm23_vm0, %v718_v38, 0.0  ;;  %v719_v41 = vmul.f32 %v2573_v36, %v2573_v36 }
 0x65e   :  { %721 = vadd.xlane.f32.xlu1 %v720_v39  ;;  %2068 = vmatpush3.bf16.msra.mxu0 %v2225_v1 }
 0x65f   :  { %v723_v42 = vsel %vm23_vm0, %v719_v41, 0.0  ;;  %2081 = vmatprep.subr.bf16.mxu0 %v2342_v6 }
 0x660   :  { %724 = vadd.xlane.f32.xlu0 %v723_v42 }
 0x676   :  { %826 = vrot.lane.b32.xlu0 %v2224_v0, %s2351_s0 }
 0x67a   :  { %828 = vrot.lane.b32.xlu0 %v2225_v1, %s2351_s0 }
 0x67e   :  { %922 = vrot.lane.b32.xlu0 %v2228_v62, %s2355_s6 }
 0x6eb   :  { %v722_v43 = vpop.xlane.xlu1 %721 }
 0x6ec   :  { %v726_v45 = vmul.f32 0.03125, %v722_v43 }
 0x6ed   :  { %v725_v46 = vpop.xlane.xlu0 %724 }
 0x6ee   :  { %v728_v47 = vadd.f32 1e-05, %v726_v45  ;;  %v727_v48 = vmul.f32 0.03125, %v725_v46 }
 0x6f0   :  { %2278 = vrsqrt.f32 %v728_v47  ;;  %v729_v49 = vadd.f32 1e-05, %v727_v48 }
 0x6f1   :  { %v827_v60 = vpop.permute.xlu0 %826 }
 0x6f2   :  { %2280 = vrsqrt.f32 %v729_v49  ;;  %2074 = vmatpush3.bf16.msra.mxu1 %v827_v60 }
 0x6f3   :  { %2075 = vmatprep.subr.bf16.mxu1 %v2342_v6 }
 0x6f5   :  { %v829_v61 = vpop.permute.xlu0 %828 }
 0x6f6   :  { %2076 = vmatpush3.bf16.msra.mxu1 %v829_v61 }
 0x6f7   :  { %2089 = vmatprep.subr.bf16.mxu1 %v2342_v6 }
 0x6f9   :  { %v923_v25 = vpop.permute.xlu0 %922 }
 0x6fa   :  { %v2279_v50 = vpop.eup %2278 }
 0x6fb   :  { %v732_v51 = vmul.f32 %v2279_v50, %v2570_v33 }
 0x6fc   :  { %v2281_v53 = vpop.eup %2280 }
 0x6fd   :  { %v733_v55 = vmul.f32 %v2281_v53, %v2573_v36  ;;  %v738_v57 = vmul.f32 %v1899_v54, %v732_v51 }
 0x6ff   :  { %v739_v58 = vmul.f32 %v1899_v54, %v733_v55  ;;  %v1906_v54 = vld [vmem:[%s2832_s3 + $0x2] ss:$0 sm:$0xff] }
 0x701   :  { %v744_v59 = vpack.c.bf16 %v739_v58, %v738_v57 }
 0x703   :  { %2070 = vmatmul.mubr.msk.bf16.vlgmr.msra.gmra.mrb[20].mxu0 %vm23_vm0, %v744_v59 }
 0x704   :  { %2085 = vmatprep.mubr.msk.bf16.mxu0 %vm2343_vm1, %v2342_v6 }
 0x7d6   :  { %v794_v63 = vpop.f32.mrb[20].mxu0 }
 0x7d7   :  { %817 = vrot.lane.b32.xlu1 %v794_v63, %s2345_s25  ;;  %v2071_v3 = vpop.f32.mrb[21].mxu0  ;;  %v1903_v9 = vmul.f32 -1.442695, %v794_v63 }
 0x7d8   :  { %v797_v4 = vpop.f32.mrb[22].mxu0 }
 0x7d9   :  { %v2072_v5 = vpop.f32.mrb[23].mxu0  ;;  %v1904_v10 = vmul.f32 -1.442695, %v797_v4  ;;  %2282 = vpow2.f32 %v1903_v9 }
 0x7db   :  { %819 = vrot.lane.b32.xlu1 %v797_v4, %s2345_s25  ;;  %2284 = vpow2.f32 %v1904_v10 }
 0x7df   :  { %924 = vrot.lane.b32.xlu1 %v2226_v8, %s2355_s6 }
 0x7e3   :  { %v2283_v11 = vpop.eup %2282 }
 0x7e4   :  { %v807_v13 = vadd.f32 1.0, %v2283_v11 }
 0x7e5   :  { %v2285_v12 = vpop.eup %2284 }
 0x7e6   :  { %v808_v14 = vadd.f32 1.0, %v2285_v12  ;;  %2286 = vrcp.f32 %v807_v13 }
 0x7e8   :  { %2288 = vrcp.f32 %v808_v14 }
 0x7f0   :  { %v2287_v16 = vpop.eup %2286 }
 0x7f1   :  { %v813_v20 = vmul.f32 %v2287_v16, %v794_v63 }
 0x7f2   :  { %v2289_v17 = vpop.eup %2288 }
 0x7f3   :  { %v814_v21 = vmul.f32 %v2289_v17, %v797_v4 }
 0x849   :  { %v818_v18 = vpop.permute.xlu1 %817 }
 0x84a   :  { %v823_v23 = vmul.f32 %v818_v18, %v813_v20 }
 0x84d   :  { %v820_v22 = vpop.permute.xlu1 %819 }
 0x84e   :  { %v824_v24 = vmul.f32 %v820_v22, %v814_v21 }
 0x850   :  { %v825_v26 = vpack.c.bf16 %v824_v24, %v823_v23 }
 0x851   :  { %v925_v27 = vpop.permute.xlu1 %924 }
 0x852   :  { %2078 = vmatmul.mubr.msk.bf16.vlgmr.msra.gmra.mrb[20].mxu1 %vm23_vm0, %v825_v26  ;;  %v931_v28 = vsel %vm23_vm0, %v923_v25, %v925_v27 }
 0x853   :  { %2091 = vmatprep.mubr.msk.bf16.mxu1 %vm2343_vm1, %v2342_v6  ;;  %2082 = vmatpush3.bf16.msra.mxu0 %v931_v28 }
 0x854   :  { %2083 = vmatprep.subr.bf16.mxu0 %v2342_v6 }
 0x925   :  { %v869_v29 = vpop.f32.mrb[20].mxu1 }
 0x926   :  { %v2617_v30 = vadd.f32 %v869_v29, %v2570_v33  ;;  %v2079_v31 = vpop.f32.mrb[21].mxu1  ;;  %v2229_v33 = vld [vmem:[%s2831_s2 + $0x24] ss:$16 sps:$4 sm:$0xff]  }
 0x927   :  { %v872_v32 = vpop.f32.mrb[22].mxu1 }
 0x928   :  { %v2620_v34 = vadd.f32 %v872_v32, %v2573_v36  ;;  %v2080_v35 = vpop.f32.mrb[23].mxu1  ;;  %v879_v37 = vmul.f32 %v2617_v30, %v2617_v30  ;;  %v2231_v36 = vld [vmem:[%s2831_s2 + $0x28] ss:$16 sps:$4 sm:$0xff]  }
 0x92a   :  { %v881_v38 = vsel %vm23_vm0, %v879_v37, 0.0  ;;  %v880_v39 = vmul.f32 %v2620_v34, %v2620_v34 }
 0x92b   :  { %882 = vadd.xlane.f32.xlu1 %v881_v38 }
 0x92c   :  { %v884_v41 = vsel %vm23_vm0, %v880_v39, 0.0 }
 0x92d   :  { %885 = vadd.xlane.f32.xlu0 %v884_v41 }
 0x93c   :  { %926 = vrot.lane.b32.xlu1 %v2229_v33, %s2355_s6 }
 0x943   :  { %928 = vrot.lane.b32.xlu0 %v2231_v36, %s2355_s6 }
 0x9b8   :  { %v883_v42 = vpop.xlane.xlu1 %882 }
 0x9b9   :  { %v887_v0 = vmul.f32 0.03125, %v883_v42 }
 0x9ba   :  { %v886_v1 = vpop.xlane.xlu0 %885 }
 0x9bb   :  { %v889_v43 = vadd.f32 1e-05, %v887_v0  ;;  %v888_v45 = vmul.f32 0.03125, %v886_v1 }
 0x9bc   :  { %v927_v46 = vpop.permute.xlu1 %926 }
 0x9bd   :  { %2290 = vrsqrt.f32 %v889_v43  ;;  %v890_v47 = vadd.f32 1e-05, %v888_v45 }
 0x9be   :  { %v929_v48 = vpop.permute.xlu0 %928 }
 0x9bf   :  { %2292 = vrsqrt.f32 %v890_v47  ;;  %v932_v49 = vsel %vm23_vm0, %v927_v46, %v929_v48 }
 0x9c0   :  { %2084 = vmatpush3.bf16.msra.mxu0 %v932_v49 }
 0x9c1   :  { %2095 = vmatprep.subr.bf16.mxu0 %v2342_v6 }
 0x9c7   :  { %v2291_v50 = vpop.eup %2290 }
 0x9c8   :  { %v893_v51 = vmul.f32 %v2291_v50, %v2617_v30 }
 0x9c9   :  { %v2293_v53 = vpop.eup %2292 }
 0x9ca   :  { %v894_v55 = vmul.f32 %v2293_v53, %v2620_v34  ;;  %v899_v57 = vmul.f32 %v1906_v54, %v893_v51 }
 0x9cc   :  { %v900_v58 = vmul.f32 %v1906_v54, %v894_v55 }
 0x9ce   :  { %v905_v59 = vpack.c.bf16 %v900_v58, %v899_v57 }
 0x9d0   :  { %2086 = vmatmul.mubr.msk.bf16.vlgmr.msra.gmra.mrb[24].mxu0 %vm23_vm0, %v905_v59 }
 0x9d1   :  { %2097 = vmatprep.mubr.msk.bf16.mxu0 %vm2343_vm1, %v2342_v6 }
 0xaa3   :  { %v972_v60 = vpop.f32.mrb[24].mxu0 }
 0xaa4   :  { %v2087_v61 = vpop.f32.mrb[25].mxu0 }
 0xaa5   :  { %v975_v62 = vpop.f32.mrb[26].mxu0 }
 0xaa6   :  { %v2646_v63 = vpack.c.bf16 %v975_v62, %v972_v60  ;;  %v2088_v3 = vpop.f32.mrb[27].mxu0 }
 0xaa8   :  { %1108 = vrot.lane.b32.xlu0 %v2646_v63, %s2346_s26  ;;  %981 = vrot.lane.b32.xlu1 %v2646_v63, %s2345_s25 }
 0xaac   :  { %1235 = vrot.lane.b32.xlu0 %v2646_v63, %s2347_s27  ;;  %1106 = vrot.lane.b32.xlu1 %v2646_v63, %s2344_s24 }
 0xab0   :  { %1362 = vrot.lane.b32.xlu0 %v2646_v63, %s2349_s29  ;;  %1233 = vrot.lane.b32.xlu1 %v2646_v63, %s2348_s28 }
 0xab4   :  { %1360 = vrot.lane.b32.xlu1 %v2646_v63, %s2350_s30 }
 0xb1a   :  { %v982_v4 = vpop.permute.xlu1 %981  ;;  %v1109_v8 = vpop.permute.xlu0 %1108 }
 0xb1b   :  { %v987_v5 = vsel %vm110_vm2, %v982_v4, 0  ;;  %v1114_v9 = vsel %vm110_vm2, %v1109_v8, 0 }
 0xb1c   :  { %2090 = vmatpush3.bf16.xpose.msra.mxu1 %v987_v5 }
 0xb1d   :  { %2101 = vmatprep.subr.bf16.mxu1 %v2342_v6 }
 0xb1e   :  { %v1236_v10 = vpop.permute.xlu0 %1235  ;;  %v1107_v11 = vpop.permute.xlu1 %1106 }
 0xb1f   :  { %v1241_v12 = vsel %vm110_vm2, %v1236_v10, 0 }
 0xb22   :  { %v1363_v13 = vpop.permute.xlu0 %1362  ;;  %v1234_v14 = vpop.permute.xlu1 %1233 }
 0xb23   :  { %2092 = vmatmul.mubr.msk.bf16.vlgmr.msra.gmra.mrb[24].mxu1 %vm110_vm2, %v2646_v63  ;;  %v1368_v16 = vsel %vm110_vm2, %v1363_v13, 0 }
 0xb24   :  { %2102 = vmatpush3.bf16.xpose.msra.mxu1 %v1114_v9  ;;  %2103 = vmatprep.mubr.msk.bf16.mxu1 %vm2343_vm1, %v2342_v6 }
 0xb25   :  { %2113 = vmatprep.subr.bf16.mxu1 %v2342_v6 }
 0xb26   :  { %v1361_v17 = vpop.permute.xlu1 %1360 }
 0xb2b   :  { %2104 = vmatmul.mubr.msk.bf16.vlgmr.msra.gmra.mrb[28].mxu1 %vm110_vm2, %v1107_v11 }
 0xb2c   :  { %2114 = vmatpush3.bf16.xpose.msra.mxu1 %v1241_v12  ;;  %2115 = vmatprep.mubr.msk.bf16.mxu1 %vm2343_vm1, %v2342_v6 }
 0xb2d   :  { %2125 = vmatprep.subr.bf16.mxu1 %v2342_v6 }
 0xb33   :  { %2116 = vmatmul.mubr.msk.bf16.vlgmr.msra.gmra.mrb[32].mxu1 %vm110_vm2, %v1234_v14 }
 0xb34   :  { %2126 = vmatpush3.bf16.xpose.msra.mxu1 %v1368_v16  ;;  %2127 = vmatprep.mubr.msk.bf16.mxu1 %vm2343_vm1, %v2342_v6 }
 0xb35   :  { %2137 = vmatprep.subr.bf16.mxu1 %v2342_v6 }
 0xb3b   :  { %2128 = vmatmul.mubr.msk.bf16.vlgmr.msra.gmra.mrb[36].mxu1 %vm110_vm2, %v1361_v17 }
 0xb3c   :  { %2141 = vmatprep.mubr.msk.bf16.mxu1 %vm2343_vm1, %v2342_v6 }
 0xbf6   :  { %v1023_v18 = vpop.f32.mrb[24].mxu1 }
 0xbf7   :  { %v1030_v20 = vmul.f32 0.35355338, %v1023_v18  ;;  %v2093_v21 = vpop.f32.mrb[25].mxu1 }
 0xbf8   :  { %v1026_v22 = vpop.f32.mrb[26].mxu1 }
 0xbf9   :  { %v1031_v23 = vmul.f32 0.35355338, %v1026_v22  ;;  %v2094_v24 = vpop.f32.mrb[27].mxu1  ;;  %v1034_v26 = vadd.f32 %v1030_v20, %v2462_v40 }
 0xbfb   :  { %v1036_v25 = vsel %vm164_vm3, %v1034_v26, -inf  ;;  %v1035_v27 = vadd.f32 %v1031_v23, %v2467_v44 }
 0xbfc   :  { %1037 = vmax.xlane.f32.xlu0 %v1036_v25 }
 0xbfd   :  { %v1039_v28 = vsel %vm164_vm3, %v1035_v27, -inf }
 0xbfe   :  { %1040 = vmax.xlane.f32.xlu1 %v1039_v28  ;;  %v1150_v29 = vpop.f32.mrb[28].mxu1 }
 0xbff   :  { %v1157_v31 = vmul.f32 0.35355338, %v1150_v29  ;;  %v2105_v32 = vpop.f32.mrb[29].mxu1 }
 0xc00   :  { %v1153_v35 = vpop.f32.mrb[30].mxu1 }
 0xc01   :  { %v1158_v37 = vmul.f32 0.35355338, %v1153_v35  ;;  %v2106_v38 = vpop.f32.mrb[31].mxu1  ;;  %v1161_v39 = vadd.f32 %v2476_v52, %v1157_v31 }
 0xc03   :  { %v1163_v41 = vsel %vm164_vm3, %v1161_v39, -inf  ;;  %v1162_v40 = vadd.f32 %v2481_v56, %v1158_v37 }
 0xc04   :  { %1164 = vmax.xlane.f32.xlu0 %v1163_v41 }
 0xc05   :  { %v1166_v42 = vsel %vm164_vm3, %v1162_v40, -inf }
 0xc06   :  { %v1277_v33 = vpop.f32.mrb[32].mxu1 }
 0xc07   :  { %v1284_v36 = vmul.f32 0.35355338, %v1277_v33  ;;  %v2117_v44 = vpop.f32.mrb[33].mxu1 }
 0xc08   :  { %1167 = vmax.xlane.f32.xlu0 %v1166_v42  ;;  %v1280_v0 = vpop.f32.mrb[34].mxu1 }
 0xc09   :  { %v1285_v1 = vmul.f32 0.35355338, %v1280_v0  ;;  %v2118_v43 = vpop.f32.mrb[35].mxu1  ;;  %v1288_v45 = vadd.f32 %v2490_v2, %v1284_v36 }
 0xc0b   :  { %v1290_v46 = vsel %vm164_vm3, %v1288_v45, -inf  ;;  %v1289_v52 = vadd.f32 %v2495_v7, %v1285_v1 }
 0xc0c   :  { %1291 = vmax.xlane.f32.xlu1 %v1290_v46 }
 0xc0d   :  { %v1293_v47 = vsel %vm164_vm3, %v1289_v52, -inf }
 0xc0e   :  { %1294 = vmax.xlane.f32.xlu0 %v1293_v47  ;;  %v1404_v56 = vpop.f32.mrb[36].mxu1 }
 0xc0f   :  { %v1411_v48 = vmul.f32 0.35355338, %v1404_v56  ;;  %v2129_v49 = vpop.f32.mrb[37].mxu1 }
 0xc10   :  { %v1407_v50 = vpop.f32.mrb[38].mxu1 }
 0xc11   :  { %v1412_v51 = vmul.f32 0.35355338, %v1407_v50  ;;  %v2130_v53 = vpop.f32.mrb[39].mxu1  ;;  %v1415_v54 = vadd.f32 %v2504_v15, %v1411_v48 }
 0xc13   :  { %v1417_v55 = vsel %vm164_vm3, %v1415_v54, -inf  ;;  %v1416_v2 = vadd.f32 %v2509_v19, %v1412_v51 }
 0xc14   :  { %1418 = vmax.xlane.f32.xlu1 %v1417_v55 }
 0xc15   :  { %v1420_v57 = vsel %vm164_vm3, %v1416_v2, -inf }
 0xc16   :  { %1421 = vmax.xlane.f32.xlu0 %v1420_v57 }
 0xc25   :  { %1059 = vrot.lane.b32.xlu1 %v2646_v63, %s2351_s0 }
 0xc89   :  { %v1038_v7 = vpop.xlane.xlu0 %1037 }
 0xc8a   :  { %v1042_v58 = vsub.f32 %v1034_v26, %v1038_v7 }
 0xc8b   :  { %v1041_v59 = vpop.xlane.xlu1 %1040 }
 0xc8c   :  { %v1044_v60 = vmul.f32 1.442695, %v1042_v58  ;;  %v1043_v61 = vsub.f32 %v1035_v27, %v1041_v59 }
 0xc8e   :  { %2294 = vpow2.f32 %v1044_v60  ;;  %v1046_v62 = vmul.f32 1.442695, %v1043_v61 }
 0xc90   :  { %2296 = vpow2.f32 %v1046_v62 }
 0xc91   :  { %v1165_v15 = vpop.xlane.xlu0 %1164 }
 0xc92   :  { %v1169_v3 = vsub.f32 %v1161_v39, %v1165_v15 }
 0xc94   :  { %v1171_v4 = vmul.f32 1.442695, %v1169_v3 }
 0xc95   :  { %v1168_v5 = vpop.xlane.xlu0 %1167 }
 0xc96   :  { %2298 = vpow2.f32 %v1171_v4  ;;  %v1170_v19 = vsub.f32 %v1162_v40, %v1168_v5 }
 0xc98   :  { %v2295_v8 = vpop.eup %2294  ;;  %v1173_v9 = vmul.f32 1.442695, %v1170_v19 }
 0xc99   :  { %v1292_v10 = vpop.xlane.xlu1 %1291  ;;  %v1048_v11 = vsel %vm164_vm3, %v2295_v8, 0.0 }
 0xc9a   :  { %v2297_v12 = vpop.eup %2296  ;;  %2300 = vpow2.f32 %v1173_v9  ;;  %v1296_v13 = vsub.f32 %v1288_v45, %v1292_v10  ;;  %1049 = vadd.xlane.f32.xlu1 %v1048_v11 }
 0xc9b   :  { %v1295_v14 = vpop.xlane.xlu0 %1294  ;;  %v1051_v16 = vsel %vm164_vm3, %v2297_v12, 0.0 }
 0xc9c   :  { %v1298_v17 = vmul.f32 1.442695, %v1296_v13  ;;  %v1297_v18 = vsub.f32 %v1289_v52, %v1295_v14  ;;  %1052 = vadd.xlane.f32.xlu0 %v1051_v16 }
 0xc9e   :  { %2302 = vpow2.f32 %v1298_v17  ;;  %v1300_v20 = vmul.f32 1.442695, %v1297_v18 }
 0xca0   :  { %v2299_v21 = vpop.eup %2298  ;;  %2304 = vpow2.f32 %v1300_v20 }
 0xca1   :  { %v1419_v22 = vpop.xlane.xlu1 %1418  ;;  %v1175_v23 = vsel %vm164_vm3, %v2299_v21, 0.0 }
 0xca2   :  { %v1423_v24 = vsub.f32 %v1415_v54, %v1419_v22  ;;  %1176 = vadd.xlane.f32.xlu1 %v1175_v23 }
 0xca3   :  { %v1422_v26 = vpop.xlane.xlu0 %1421 }
 0xca4   :  { %v2301_v25 = vpop.eup %2300  ;;  %v1425_v27 = vmul.f32 1.442695, %v1423_v24  ;;  %v1424_v28 = vsub.f32 %v1416_v2, %v1422_v26 }
 0xca5   :  { %v1060_v29 = vpop.permute.xlu1 %1059  ;;  %v1178_v31 = vsel %vm164_vm3, %v2301_v25, 0.0 }
 0xca6   :  { %2306 = vpow2.f32 %v1425_v27  ;;  %v1427_v32 = vmul.f32 1.442695, %v1424_v28  ;;  %1179 = vadd.xlane.f32.xlu0 %v1178_v31  ;;  %2096 = vmatpush3.bf16.msra.mxu0 %v1060_v29  ;;  %v2236_v29 = vld [vmem:[%s2831_s2 + $0x8] ss:$16 sps:$4 sm:$0xff]  }
 0xca7   :  { %2107 = vmatprep.subr.bf16.mxu0 %v2342_v6 }
 0xca8   :  { %v2303_v35 = vpop.eup %2302  ;;  %2308 = vpow2.f32 %v1427_v32 }
 0xca9   :  { %v1302_v37 = vsel %vm164_vm3, %v2303_v35, 0.0 }
 0xcaa   :  { %v2305_v38 = vpop.eup %2304  ;;  %1303 = vadd.xlane.f32.xlu1 %v1302_v37  ;;  %v2234_v37 = vld [vmem:[%s2831_s2 + $0xc] ss:$16 sps:$4 sm:$0xff]  }
 0xcab   :  { %v1305_v39 = vsel %vm164_vm3, %v2305_v38, 0.0 }
 0xcac   :  { %1306 = vadd.xlane.f32.xlu0 %v1305_v39 }
 0xcb0   :  { %v2307_v41 = vpop.eup %2306 }
 0xcb1   :  { %v1429_v40 = vsel %vm164_vm3, %v2307_v41, 0.0 }
 0xcb2   :  { %v2309_v33 = vpop.eup %2308  ;;  %1430 = vadd.xlane.f32.xlu1 %v1429_v40 }
 0xcb3   :  { %v1432_v36 = vsel %vm164_vm3, %v2309_v33, 0.0 }
 0xcb4   :  { %1433 = vadd.xlane.f32.xlu0 %v1432_v36 }
 0xcc3   :  { %1313 = vrot.lane.b32.xlu1 %v2646_v63, %s2352_s1 }
 0xcc7   :  { %1440 = vrot.lane.b32.xlu1 %v2646_v63, %s2353_s21 }
 0xcca   :  { %1186 = vrot.lane.b32.xlu0 %v2646_v63, %s2354_s22 }
 0xd27   :  { %v1050_v44 = vpop.xlane.xlu1 %1049 }
 0xd28   :  { %2310 = vrcp.f32 %v1050_v44 }
 0xd29   :  { %v1053_v42 = vpop.xlane.xlu0 %1052 }
 0xd2a   :  { %2312 = vrcp.f32 %v1053_v42 }
 0xd2f   :  { %v1177_v52 = vpop.xlane.xlu1 %1176 }
 0xd32   :  { %v2311_v0 = vpop.eup %2310 }
 0xd33   :  { %v1180_v1 = vpop.xlane.xlu0 %1179  ;;  %v1056_v45 = vmul.f32 %v2311_v0, %v2295_v8  ;;  %v2232_v8 = vld [vmem:[%s2831_s2 + $0x8] ss:$16 sps:$4 sm:$0xff]  }
 0xd34   :  { %v2313_v43 = vpop.eup %2312  ;;  %2314 = vrcp.f32 %v1180_v1  ;;  %1532 = vrot.lane.b32.xlu0 %v2232_v8, %s2351_s0 }
 0xd35   :  { %v1057_v46 = vmul.f32 %v2313_v43, %v2297_v12  ;;  %2316 = vrcp.f32 %v1177_v52 }
 0xd37   :  { %v1058_v47 = vpack.c.bf16 %v1057_v46, %v1056_v45  ;;  %v1304_v63 = vpop.xlane.xlu1 %1303 }
 0xd39   :  { %2098 = vmatmul.mubr.msk.bf16.vlgmr.msra.gmra.mrb[28].mxu0 %vm164_vm3, %v1058_v47  ;;  %v1307_v56 = vpop.xlane.xlu0 %1306 }
 0xd3a   :  { %2109 = vmatprep.mubr.msk.bf16.mxu0 %vm2343_vm1, %v2342_v6  ;;  %2318 = vrcp.f32 %v1307_v56 }
 0xd3b   :  { %2320 = vrcp.f32 %v1304_v63 }
 0xd3e   :  { %v2315_v48 = vpop.eup %2314 }
 0xd3f   :  { %v2317_v50 = vpop.eup %2316  ;;  %v1184_v51 = vmul.f32 %v2315_v48, %v2301_v25  ;;  %v1431_v53 = vpop.xlane.xlu1 %1430  ;;  %v2233_v25 = vld [vmem:[%s2831_s2 + $0x28] ss:$16 sps:$4 sm:$0xff]  }
 0xd40   :  { %v1183_v54 = vmul.f32 %v2317_v50, %v2299_v21 }
 0xd41   :  { %v1434_v49 = vpop.xlane.xlu0 %1433 }
 0xd42   :  { %2322 = vrcp.f32 %v1434_v49  ;;  %v1185_v2 = vpack.c.bf16 %v1184_v51, %v1183_v54 }
 0xd43   :  { %2324 = vrcp.f32 %v1431_v53  ;;  %v1314_v7 = vpop.permute.xlu1 %1313 }
 0xd44   :  { %v2319_v57 = vpop.eup %2318 }
 0xd45   :  { %v1187_v55 = vpop.permute.xlu0 %1186  ;;  %v2321_v58 = vpop.eup %2320  ;;  %v1311_v59 = vmul.f32 %v2319_v57, %v2305_v38 }
 0xd46   :  { %2108 = vmatpush3.bf16.msra.mxu0 %v1187_v55  ;;  %v1310_v60 = vmul.f32 %v2321_v58, %v2303_v35 }
 0xd47   :  { %2119 = vmatprep.subr.bf16.mxu0 %v2342_v6  ;;  %v1441_v15 = vpop.permute.xlu1 %1440 }
 0xd48   :  { %v1312_v61 = vpack.c.bf16 %v1311_v59, %v1310_v60 }
 0xd49   :  { %2110 = vmatmul.mubr.msk.bf16.vlgmr.msra.gmra.mrb[32].mxu0 %vm164_vm3, %v1185_v2 }
 0xd4a   :  { %2120 = vmatpush3.bf16.msra.mxu0 %v1314_v7  ;;  %2121 = vmatprep.mubr.msk.bf16.mxu0 %vm2343_vm1, %v2342_v6 }
 0xd4b   :  { %2131 = vmatprep.subr.bf16.mxu0 %v2342_v6 }
 0xd4c   :  { %v2323_v62 = vpop.eup %2322 }
 0xd4d   :  { %v2325_v3 = vpop.eup %2324  ;;  %v1438_v4 = vmul.f32 %v2323_v62, %v2309_v33 }
 0xd4e   :  { %v1437_v5 = vmul.f32 %v2325_v3, %v2307_v41 }
 0xd50   :  { %v1439_v19 = vpack.c.bf16 %v1438_v4, %v1437_v5 }
 0xd51   :  { %2122 = vmatmul.mubr.msk.bf16.vlgmr.msra.gmra.mrb[36].mxu0 %vm164_vm3, %v1312_v61  ;;  %v2786_v61 = vld [vmem:[%s2831_s2 + $0xc] ss:$16 sps:$4 sm:$0xff]  }
 0xd52   :  { %2132 = vmatpush3.bf16.msra.mxu0 %v1441_v15  ;;  %2133 = vmatprep.mubr.msk.bf16.mxu0 %vm2343_vm1, %v2342_v6 }
 0xd53   :  { %2145 = vmatprep.subr.bf16.mxu0 %v2342_v6 }
 0xd59   :  { %2134 = vmatmul.mubr.msk.bf16.vlgmr.msra.gmra.mrb[40].mxu0 %vm164_vm3, %v1439_v19 }
 0xd5a   :  { %2149 = vmatprep.mubr.msk.bf16.mxu0 %vm2343_vm1, %v2342_v6 }
 0xda6   :  { %v1533_v13 = vpop.permute.xlu0 %1532 }
 0xda7   :  { %2138 = vmatpush3.bf16.msra.mxu1 %v1533_v13 }
 0xda8   :  { %2139 = vmatprep.subr.bf16.mxu1 %v2342_v6 }
 0xe0c   :  { %v1099_v9 = vpop.f32.mrb[28].mxu0 }
 0xe0d   :  { %v2099_v10 = vpop.f32.mrb[29].mxu0 }
 0xe0e   :  { %v1102_v11 = vpop.f32.mrb[30].mxu0 }
 0xe0f   :  { %v2100_v12 = vpop.f32.mrb[31].mxu0 }
 0xe1c   :  { %v1226_v14 = vpop.f32.mrb[32].mxu0 }
 0xe1d   :  { %v2111_v16 = vpop.f32.mrb[33].mxu0 }
 0xe1e   :  { %v1229_v17 = vpop.f32.mrb[34].mxu0 }
 0xe1f   :  { %v2205_v18 = vpack.i.bf16 %v1229_v17, %v1226_v14  ;;  %v2112_v20 = vpop.f32.mrb[35].mxu0  ;;  %v1929_v14 = vld [vmem:[%s2832_s3 + $0x3] ss:$0 sm:$0xff] }
 0xe21   :  { %2206 = vrot.lane.b32.xlu1 %v2205_v18, %s2356_s7 }
 0xe24   :  { %v1353_v21 = vpop.f32.mrb[36].mxu0 }
 0xe25   :  { %v2123_v22 = vpop.f32.mrb[37].mxu0 }
 0xe26   :  { %v1356_v23 = vpop.f32.mrb[38].mxu0 }
 0xe27   :  { %v2210_v24 = vpack.i.bf16 %v1356_v23, %v1353_v21  ;;  %v2124_v26 = vpop.f32.mrb[39].mxu0 }
 0xe29   :  { %2211 = vrot.lane.b32.xlu0 %v2210_v24, %s2357_s8  ;;  %v2241_v24 = vld [vmem:[%s2831_s2 + $0x2c] ss:$16 sps:$4 sm:$0xff]  }
 0xe2c   :  { %v1480_v27 = vpop.f32.mrb[40].mxu0 }
 0xe2d   :  { %v2135_v28 = vpop.f32.mrb[41].mxu0  ;;  %1534 = vrot.lane.b32.xlu0 %v2233_v25, %s2351_s0 }
 0xe2e   :  { %v1483_v31 = vpop.f32.mrb[42].mxu0 }
 0xe2f   :  { %v2215_v32 = vpack.i.bf16 %v1483_v31, %v1480_v27  ;;  %v2136_v35 = vpop.f32.mrb[43].mxu0 }
 0xe31   :  { %2216 = vrot.lane.b32.xlu1 %v2215_v32, %s2358_s11  ;;  %1628 = vrot.lane.b32.xlu0 %v2236_v29, %s2355_s6 }
 0xe35   :  { %1630 = vrot.lane.b32.xlu1 %v2234_v37, %s2355_s6 }
 0xe93   :  { %v2207_v39 = vpop.permute.xlu1 %2206 }
 0xe94   :  { %v2209_v40 = vunpack.i.h.bf16 %v2207_v39  ;;  %v2208_v33 = vunpack.i.l.bf16 %v2207_v39 }
 0xe96   :  { %v1512_v0 = vsel %vm110_vm2, %v1102_v11, %v2209_v40  ;;  %v1511_v1 = vsel %vm110_vm2, %v1099_v9, %v2208_v33 }
 0xe9b   :  { %v2212_v38 = vpop.permute.xlu0 %2211 }
 0xe9c   :  { %v2214_v36 = vunpack.i.h.bf16 %v2212_v38  ;;  %v2213_v44 = vunpack.i.l.bf16 %v2212_v38 }
 0xe9e   :  { %v1514_v46 = vsel %vm164_vm3, %v1512_v0, %v2214_v36  ;;  %v1513_v52 = vsel %vm164_vm3, %v1511_v1, %v2213_v44 }
 0xe9f   :  { %v1535_v41 = vpop.permute.xlu0 %1534 }
 0xea0   :  { %2140 = vmatpush3.bf16.msra.mxu1 %v1535_v41 }
 0xea1   :  { %2153 = vmatprep.subr.bf16.mxu1 %v2342_v6 }
 0xea3   :  { %v2217_v42 = vpop.permute.xlu1 %2216  ;;  %v1629_v48 = vpop.permute.xlu0 %1628 }
 0xea4   :  { %v2219_v43 = vunpack.i.h.bf16 %v2217_v42  ;;  %v2218_v45 = vunpack.i.l.bf16 %v2217_v42 }
 0xea6   :  { %v1516_v47 = vsel %vm647_vm4, %v1514_v46, %v2219_v43  ;;  %v1515_v56 = vsel %vm647_vm4, %v1513_v52, %v2218_v45 }
 0xea7   :  { %v1521_v63 = vpack.c.bf16 %v1516_v47, %v1515_v56  ;;  %v1631_v49 = vpop.permute.xlu1 %1630 }
 0xea8   :  { %v1636_v50 = vsel %vm23_vm0, %v1629_v48, %v1631_v49 }
 0xea9   :  { %2142 = vmatmul.mubr.msk.bf16.vlgmr.msra.gmra.mrb[40].mxu1 %vm23_vm0, %v1521_v63  ;;  %2146 = vmatpush3.bf16.msra.mxu0 %v1636_v50 }
 0xeaa   :  { %2157 = vmatprep.mubr.msk.bf16.mxu1 %vm2343_vm1, %v2342_v6  ;;  %2147 = vmatprep.subr.bf16.mxu0 %v2342_v6 }
 0xf7c   :  { %v1575_v51 = vpop.f32.mrb[40].mxu1 }
 0xf7d   :  { %v2764_v53 = vadd.f32 %v1575_v51, %v2617_v30  ;;  %v2143_v54 = vpop.f32.mrb[41].mxu1  ;;  %v2237_v30 = vld [vmem:[%s2831_s2 + $0x28] ss:$16 sps:$4 sm:$0xff]  }
 0xf7e   :  { %v1578_v55 = vpop.f32.mrb[42].mxu1 }
 0xf7f   :  { %v2767_v2 = vadd.f32 %v1578_v55, %v2620_v34  ;;  %v2144_v57 = vpop.f32.mrb[43].mxu1  ;;  %v1585_v7 = vmul.f32 %v2764_v53, %v2764_v53  ;;  %v2239_v34 = vld [vmem:[%s2831_s2 + $0x2c] ss:$16 sps:$4 sm:$0xff]  }
 0xf81   :  { %v1587_v58 = vsel %vm23_vm0, %v1585_v7, 0.0  ;;  %v1586_v59 = vmul.f32 %v2767_v2, %v2767_v2 }
 0xf82   :  { %1588 = vadd.xlane.f32.xlu1 %v1587_v58 }
 0xf83   :  { %v1590_v60 = vsel %vm23_vm0, %v1586_v59, 0.0 }
 0xf84   :  { %1591 = vadd.xlane.f32.xlu0 %v1590_v60 }
 0xf93   :  { %1632 = vrot.lane.b32.xlu1 %v2237_v30, %s2355_s6  ;;  %v1940_v30 = vld [vmem:[%s2832_s3 + $0x4] ss:$0 sm:$0xff] }
 0xf97   :  { %1723 = vrot.lane.b32.xlu1 %v2786_v61, %s2345_s25 }
 0xf9a   :  { %1634 = vrot.lane.b32.xlu0 %v2239_v34, %s2355_s6 }
0x100f   :  { %v1589_v62 = vpop.xlane.xlu1 %1588 }
0x1010   :  { %v1593_v15 = vmul.f32 0.03125, %v1589_v62 }
0x1011   :  { %v1592_v3 = vpop.xlane.xlu0 %1591 }
0x1012   :  { %v1595_v4 = vadd.f32 1e-05, %v1593_v15  ;;  %v1594_v5 = vmul.f32 0.03125, %v1592_v3 }
0x1013   :  { %v1633_v19 = vpop.permute.xlu1 %1632 }
0x1014   :  { %2326 = vrsqrt.f32 %v1595_v4  ;;  %v1596_v8 = vadd.f32 1e-05, %v1594_v5 }
0x1015   :  { %v1635_v9 = vpop.permute.xlu0 %1634 }
0x1016   :  { %2328 = vrsqrt.f32 %v1596_v8  ;;  %v1637_v10 = vsel %vm23_vm0, %v1633_v19, %v1635_v9  ;;  %v1856_v9 = vlaneseq }
0x1017   :  { %2148 = vmatpush3.bf16.msra.mxu0 %v1637_v10  ;;  %v1724_v21 = vpop.permute.xlu1 %1723 }
0x1018   :  { %2161 = vmatprep.subr.bf16.mxu0 %v2342_v6  ;;  %2154 = vmatpush3.bf16.msra.mxu1 %v1724_v21  ;;  %v1857_v10 = vand.u32 127, %v1856_v9 }
0x1019   :  { %2155 = vmatprep.subr.bf16.mxu1 %v2342_v6 }
0x101e   :  { %v2327_v11 = vpop.eup %2326 }
0x101f   :  { %v1599_v12 = vmul.f32 %v2327_v11, %v2764_v53  ;;  %v1858_v11 = vcvt.s32.f32 %v1857_v10 }
0x1020   :  { %v2329_v13 = vpop.eup %2328 }
0x1021   :  { %v1600_v16 = vmul.f32 %v2329_v13, %v2767_v2  ;;  %v1605_v17 = vmul.f32 %v1929_v14, %v1599_v12 }
0x1023   :  { %v1606_v18 = vmul.f32 %v1929_v14, %v1600_v16 }
0x1025   :  { %v1611_v20 = vpack.c.bf16 %v1606_v18, %v1605_v17 }
0x1027   :  { %2150 = vmatmul.mubr.msk.bf16.vlgmr.msra.gmra.mrb[44].mxu0 %vm23_vm0, %v1611_v20 }
0x1028   :  { %2165 = vmatprep.mubr.msk.bf16.mxu0 %vm2343_vm1, %v2342_v6 }
0x10fa   :  { %v1677_v22 = vpop.f32.mrb[44].mxu0 }
0x10fb   :  { %1700 = vrot.lane.b32.xlu0 %v1677_v22, %s2345_s25  ;;  %v2151_v23 = vpop.f32.mrb[45].mxu0  ;;  %v1935_v27 = vmul.f32 -1.442695, %v1677_v22 }
0x10fc   :  { %v1680_v26 = vpop.f32.mrb[46].mxu0 }
0x10fd   :  { %1702 = vrot.lane.b32.xlu1 %v1680_v26, %s2345_s25  ;;  %v2152_v25 = vpop.f32.mrb[47].mxu0  ;;  %v1936_v28 = vmul.f32 -1.442695, %v1680_v26  ;;  %2330 = vpow2.f32 %v1935_v27 }
0x10ff   :  { %1725 = vrot.lane.b32.xlu0 %v2241_v24, %s2345_s25  ;;  %2332 = vpow2.f32 %v1936_v28 }
0x1107   :  { %v2331_v29 = vpop.eup %2330 }
0x1108   :  { %v1690_v32 = vadd.f32 1.0, %v2331_v29 }
0x1109   :  { %v2333_v31 = vpop.eup %2332 }
0x110a   :  { %v1691_v35 = vadd.f32 1.0, %v2333_v31  ;;  %2334 = vrcp.f32 %v1690_v32 }
0x110c   :  { %2336 = vrcp.f32 %v1691_v35 }
0x1114   :  { %v2335_v37 = vpop.eup %2334 }
0x1115   :  { %v1696_v41 = vmul.f32 %v2335_v37, %v1677_v22 }
0x1116   :  { %v2337_v38 = vpop.eup %2336 }
0x1117   :  { %v1697_v40 = vmul.f32 %v2337_v38, %v1680_v26 }
0x116d   :  { %v1701_v39 = vpop.permute.xlu0 %1700 }
0x116e   :  { %v1706_v36 = vmul.f32 %v1701_v39, %v1696_v41 }
0x116f   :  { %v1703_v33 = vpop.permute.xlu1 %1702 }
0x1170   :  { %v1707_v44 = vmul.f32 %v1703_v33, %v1697_v40 }
0x1171   :  { %v1726_v42 = vpop.permute.xlu0 %1725 }
0x1172   :  { %v1712_v0 = vpack.c.bf16 %v1707_v44, %v1706_v36  ;;  %2156 = vmatpush3.bf16.msra.mxu1 %v1726_v42 }
0x1175   :  { %2158 = vmatmul.mubr.msk.bf16.vlgmr.msra.gmra.mrb[44].mxu1 %vm23_vm0, %v1712_v0 }
0x1248   :  { %v1766_v1 = vpop.f32.mrb[44].mxu1 }
0x1249   :  { %v1773_v43 = vadd.f32 %v1766_v1, %v2764_v53  ;;  %v2159_v45 = vpop.f32.mrb[45].mxu1 }
0x124a   :  { %v1769_v46 = vpop.f32.mrb[46].mxu1 }
0x124b   :  { %v1774_v52 = vadd.f32 %v1769_v46, %v2767_v2  ;;  %v2160_v47 = vpop.f32.mrb[47].mxu1  ;;  %v1776_v56 = vmul.f32 %v1773_v43, %v1773_v43 }
0x124d   :  { %v1778_v63 = vsel %vm23_vm0, %v1776_v56, 0.0  ;;  %v1777_v48 = vmul.f32 %v1774_v52, %v1774_v52 }
0x124e   :  { %1779 = vadd.xlane.f32.xlu1 %v1778_v63 }
0x124f   :  { %v1781_v49 = vsel %vm23_vm0, %v1777_v48, 0.0 }
0x1250   :  { %1782 = vadd.xlane.f32.xlu0 %v1781_v49 }
0x125f   :  { %1801 = vrot.lane.b32.xlu1 %v2241_v24, %s2351_s0 }
0x1266   :  { %1799 = vrot.lane.b32.xlu0 %v2786_v61, %s2351_s0 }
0x12db   :  { %v1780_v50 = vpop.xlane.xlu1 %1779 }
0x12dc   :  { %v1784_v51 = vmul.f32 0.03125, %v1780_v50 }
0x12dd   :  { %v1783_v53 = vpop.xlane.xlu0 %1782 }
0x12de   :  { %v1786_v54 = vadd.f32 1e-05, %v1784_v51  ;;  %v1785_v55 = vmul.f32 0.03125, %v1783_v53 }
0x12df   :  { %v1802_v7 = vpop.permute.xlu1 %1801 }
0x12e0   :  { %2338 = vrsqrt.f32 %v1786_v54  ;;  %v1787_v2 = vadd.f32 1e-05, %v1785_v55 }
0x12e1   :  { %v1800_v57 = vpop.permute.xlu0 %1799 }
0x12e2   :  { %2340 = vrsqrt.f32 %v1787_v2  ;;  %2162 = vmatpush3.bf16.msra.mxu0 %v1800_v57 }
0x12e3   :  { %2163 = vmatprep.subr.bf16.mxu0 %v2342_v6 }
0x12e6   :  { %2164 = vmatpush3.bf16.msra.mxu0 %v1802_v7 }
0x12ea   :  { %v2339_v58 = vpop.eup %2338 }
0x12eb   :  { %v1790_v59 = vmul.f32 %v2339_v58, %v1773_v43 }
0x12ec   :  { %v2341_v60 = vpop.eup %2340 }
0x12ed   :  { %v1791_v34 = vmul.f32 %v2341_v60, %v1774_v52  ;;  %v1796_v61 = vmul.f32 %v1940_v30, %v1790_v59 }
0x12ef   :  { %v1797_v62 = vmul.f32 %v1940_v30, %v1791_v34 }
0x12f1   :  { %v1798_v15 = vpack.c.bf16 %v1797_v62, %v1796_v61 }
0x12f3   :  { %2166 = vmatmul.mubr.msk.bf16.vlgmr.msra.gmra.mrb[48].mxu0 %vm23_vm0, %v1798_v15 }
0x13c6   :  { %v1842_v3 = vpop.f32.mrb[48].mxu0 }
0x13c7   :  { %v2167_v4 = vpop.f32.mrb[49].mxu0  ;;  %v1850_v5 = vsel %vm1849_vm5, %v1842_v3, -inf }
0x13c8   :  { %1851 = vmax.xlane.f32.xlu1 %v1850_v5  ;;  %v1845_v6 = vpop.f32.mrb[50].mxu0 }
0x13c9   :  { %v2168_v19 = vpop.f32.mrb[51].mxu0  ;;  %v1853_v8 = vsel %vm1849_vm5, %v1845_v6, -inf }
0x13ca   :  { %1854 = vmax.xlane.f32.xlu0 %v1853_v8 }
0x1455   :  { %v1852_v12 = vpop.xlane.xlu1 %1851 }
0x1456   :  { %vm1859_vm6 = vcmp.eq.f32.partialorder %v1842_v3, %v1852_v12 }
0x1457   :  { %v1855_v13 = vpop.xlane.xlu0 %1854  ;;  %v1861_v14 = vsel %vm1859_vm6, %v1858_v11, 64.0 }
0x1458   :  { %vm1860_vm7 = vcmp.eq.f32.partialorder %v1845_v6, %v1855_v13  ;;  %v1863_v16 = vsel %vm1849_vm5, %v1861_v14, inf }
0x1459   :  { %v1862_v17 = vsel %vm1860_vm7, %v1858_v11, 64.0  ;;  %1864 = vmin.xlane.f32.xlu0 %v1863_v16 }
0x145a   :  { %v1866_v18 = vsel %vm1849_vm5, %v1862_v17, inf }
0x145b   :  { %1867 = vmin.xlane.f32.xlu1 %v1866_v18 }
0x14e6   :  { %v1865_v20 = vpop.xlane.xlu0 %1864 }
0x14e7   :  { %v2169_v21 = vtrunc.f32 %v1865_v20 }
0x14e8   :  { %v1868_v22 = vpop.xlane.xlu1 %1867 }
0x14e9   :  { %v2170_v23 = vcvt.f32.s32 %v2169_v21  ;;  %v2171_v24 = vtrunc.f32 %v1868_v22 }
0x14eb   :  { %1872 = vst.msk [vmem:[%s2834_s4] sm:$0xff] %vm1871_vm8, %v2170_v23  ;;  %v2172_v26 = vcvt.f32.s32 %v2171_v24 }
0x14ed   :  { %1873 = vst.msk [vmem:[%s2834_s4 + $0x8] sm:$0xff] %vm1871_vm8, %v2172_v26 }

</bundles_post_ra>
